<compile_context>
chip_gen: v6e
topology: v6e:2x2x1
jax: 0.10.0
libtpu: 0.0.40
codegen_flags: <defaults>
</compile_context>

<pallas_src>
import math

import jax
import jax.numpy as jnp
import numpy as np
from jax import lax
from jax.experimental import pallas as pl
from jax.experimental.pallas import tpu as pltpu  # noqa: F401  (TPU backend)

# ---- problem sizes (small, consistent with the module's forward) ----
B = 2                   # batch
NUM_ENV = 4             # undefined global in the reference; pick 4
W_OTHER = NUM_ENV - 1   # other agents (W dim of the obs conv input)
ROBOT_DIM = 4           # robot_state_dim (conv in-channels)
OBS_DIM = 4             # obs_state_dim  (conv in-channels)
GOAL_DIM = 2
ACTION_DIM = 2          # mean = cat(sigmoid, tanh) => action_space must be 2
H_IN = 5                # two valid (3,1) convs -> H_out = 1
N_AGENTS = 2 + W_OTHER  # robot + goal + others
BN = B * N_AGENTS       # stacked node count
NUM_LAYER = 2
LOG_2PI = math.log(2.0 * math.pi)

# ------------------- parameter slab layout (static offsets) -------------------
PARAM_LANES = 64
PARAM_SPEC = (
    ("w1r", 3 * ROBOT_DIM, 64), ("b1r", 1, 64),
    ("w2r", 3 * 64, 32),        ("b2r", 1, 32),
    ("w3r", 32, 32),            ("b3r", 1, 32),
    ("w1o", 3 * OBS_DIM, 64),   ("b1o", 1, 64),
    ("w2o", 3 * 64, 32),        ("b2o", 1, 32),
    ("w3o", 32, 32),            ("b3o", 1, 32),
    ("wg1", GOAL_DIM, 64),      ("bg1", 1, 64),
    ("wg2", 64, 32),            ("bg2", 1, 32),
    ("w_a", 32, 32), ("wsa0", 32, 32), ("wsa1", 32, 32),
    ("wafc", 32, 64),           ("bafc", 1, 64),
    ("wvw", 64, ACTION_DIM),    ("bvw", 1, ACTION_DIM),
    ("wvobs", 32, 64),          ("bvobs", 1, 64),
    ("wvgoal", 64, 64),         ("bvgoal", 1, 64),
    ("wcrit", 128, 1),          ("bcrit", 1, 1),
    ("logstd", 1, ACTION_DIM),
)


def _round8(n):
    return -(-n // 8) * 8


def _param_offsets(spec):
    offs, off = {}, 0
    for name, r, c in spec:
        offs[name] = (off, r, c)
        off += _round8(r)          # 8-row aligned segments -> aligned VMEM slices
    return offs, off


PARAM_OFFSETS, PARAM_ROWS = _param_offsets(PARAM_SPEC)   # PARAM_ROWS == 1080

# data slab layout: [xr | xo | goal | noise], each segment 8-row aligned
DATA_LANES = 32
XR_OFF, XO_OFF, GOAL_OFF, NOISE_OFF = 0, 8, 16, 24
DATA_ROWS = 32


def _relu(x):
    return jnp.maximum(x, 0.0)


def _mm(a, b):
    return jnp.dot(a, b, preferred_element_type=jnp.float32)


# ------------------------------------ kernel ------------------------------------
def tcn_gacn_kernel(data_ref, params_ref, out_ref):
    def P(name):  # static slice of the packed parameter slab
        off, r, c = PARAM_OFFSETS[name]
        return params_ref[off:off + r, 0:c]

    xr = data_ref[XR_OFF:XR_OFF + B, 0:H_IN * ROBOT_DIM]                 # (B, 20)
    xo = data_ref[XO_OFF:XO_OFF + B * W_OTHER, 0:H_IN * OBS_DIM]         # (B*W, 20)
    goal = data_ref[GOAL_OFF:GOAL_OFF + B, 0:GOAL_DIM]                   # (B, 2)
    noise = data_ref[NOISE_OFF:NOISE_OFF + B, 0:ACTION_DIM]              # (B, 2)

    # ---- TCN stacks: Conv(3,1)->ReLU->Conv(3,1)->ReLU->Conv(1,1)->ReLU
    # conv1 is im2col-fused (contiguous lane slice vs. (3*Cin,64) weight);
    # conv2 consumes the lane-concatenated h1 against a (192,32) weight.
    def tcn(x, w1, b1, w2, b2, w3, b3, cin):
        h1 = [_relu(_mm(x[:, h * cin:(h + 3) * cin], w1) + b1) for h in range(3)]
        h2 = _relu(_mm(jnp.concatenate(h1, axis=1), w2) + b2)
        return _relu(_mm(h2, w3) + b3)

    x1 = tcn(xr, P("w1r"), P("b1r"), P("w2r"), P("b2r"), P("w3r"), P("b3r"),
             ROBOT_DIM)                                                  # (B, 32)
    x2 = tcn(xo, P("w1o"), P("b1o"), P("w2o"), P("b2o"), P("w3o"), P("b3o"),
             OBS_DIM)                                                    # (B*W, 32)

    # goal MLP: Linear->ReLU->Linear->ReLU
    x3 = _relu(_mm(_relu(_mm(goal, P("wg1")) + P("bg1")), P("wg2")) + P("bg2"))

    # ---- batched GCN over stacked nodes, ordered [robots(B) | goals(B) | others]
    H = jnp.concatenate([x1, x3, x2], axis=0)                            # (BN, 32)

    ri = lax.broadcasted_iota(jnp.int32, (BN, BN), 0)
    ci = lax.broadcasted_iota(jnp.int32, (BN, BN), 1)

    def batch_of(idx):  # batch id of each stacked node (no int div needed)
        bid = jnp.zeros_like(idx)
        for b in range(1, B):
            in_b = ((idx == b) | (idx == B + b) |
                    ((idx >= 2 * B + b * W_OTHER) &
                     (idx < 2 * B + (b + 1) * W_OTHER)))
            bid = jnp.where(in_b, b, bid)
        return bid

    # block-diagonal attention mask: a batch only attends within its own graph
    mask = jnp.where(batch_of(ri) == batch_of(ci), 0.0, -1e30).astype(jnp.float32)

    w_a = P("w_a")
    for name in ("wsa0", "wsa1"):   # num_layer == 2
        Hw = _mm(H, w_a)
        S = lax.dot_general(Hw, H, (((1,), (1,)), ((), ())),
                            preferred_element_type=jnp.float32) + mask   # (BN, BN)
        S = S - jnp.max(S, axis=-1, keepdims=True)
        E = jnp.exp(S)
        A = E * pl.reciprocal(jnp.sum(E, axis=-1, keepdims=True), approx=False)
        H = _relu(_mm(_mm(A, H), P(name)))

    # ---- action head (robot nodes are rows 0..B-1); a_v_fc/a_w_fc fused (64,2)
    a = _relu(_mm(H[0:B, :], P("wafc")) + P("bafc"))                     # (B, 64)
    mv = _mm(a, P("wvw")) + P("bvw")                                     # (B, 2)
    col = lax.broadcasted_iota(jnp.int32, (B, ACTION_DIM), 1)
    mean = jnp.where(col == 0, jax.nn.sigmoid(mv), jnp.tanh(mv))

    # gaussian head: torch.normal(mean, std) via external standard-normal noise
    logstd = jnp.broadcast_to(P("logstd"), (B, ACTION_DIM))
    std = jnp.exp(logstd)
    action = mean + std * noise
    logd = -(action - mean) ** 2 / (2.0 * std * std) - 0.5 * LOG_2PI - logstd
    lp = jnp.sum(logd, axis=-1, keepdims=True)

    # ---- value branch
    # NOTE: in the reference forward the value-GCN loop writes `next_H` (not
    # `next_Hv`) and skip_connection=False, so Hv stays == X_v and
    # Hv[:, 0, :] == x1; that per-iteration compute is dead code and omitted.
    v_obs = _relu(_mm(x1, P("wvobs")) + P("bvobs"))                      # (B, 64)
    v_goal = _relu(_mm(jnp.concatenate([x1, x3], axis=1), P("wvgoal"))
                   + P("bvgoal"))                                        # (B, 64)
    v = _mm(jnp.concatenate([v_obs, v_goal], axis=1), P("wcrit")) + P("bcrit")

    # single lane-dense store: [v | action | logprob | mean] -> (B, 6)
    out_ref[...] = jnp.concatenate([v, action, lp, mean], axis=1)


# ------------------------- parameter setup (deterministic) -------------------------
def init_torch_params(key):
    ks = iter(jax.random.split(key, 40))

    def nrm(shape, scale=0.1):
        return scale * jax.random.normal(next(ks), shape, dtype=jnp.float32)

    # PyTorch-layout parameters (shapes match the module's __init__)
    # TODO(synk): w_r / w_h / w_v submodules and the Wsv value-GCN never affect
    # the returned outputs (dead code in forward); not instantiated.
    return dict(
        c_r1_w=nrm((64, ROBOT_DIM, 3, 1)), c_r1_b=nrm((64,)),
        c_r2_w=nrm((32, 64, 3, 1)),        c_r2_b=nrm((32,)),
        c_r3_w=nrm((32, 32, 1, 1)),        c_r3_b=nrm((32,)),
        c_o1_w=nrm((64, OBS_DIM, 3, 1)),   c_o1_b=nrm((64,)),
        c_o2_w=nrm((32, 64, 3, 1)),        c_o2_b=nrm((32,)),
        c_o3_w=nrm((32, 32, 1, 1)),        c_o3_b=nrm((32,)),
        g1_w=nrm((64, GOAL_DIM)), g1_b=nrm((64,)),
        g2_w=nrm((32, 64)),       g2_b=nrm((32,)),
        w_a=nrm((32, 32)), wsa0=nrm((32, 32)), wsa1=nrm((32, 32)),
        afc_w=nrm((64, 32)), afc_b=nrm((64,)),
        av_w=nrm((1, 64)), av_b=nrm((1,)),
        aw_w=nrm((1, 64)), aw_b=nrm((1,)),
        vobs_w=nrm((64, 32)),  vobs_b=nrm((64,)),
        vgoal_w=nrm((64, 64)), vgoal_b=nrm((64,)),
        crit_w=nrm((1, 128)),  crit_b=nrm((1,)),
        logstd=jnp.zeros((ACTION_DIM,), jnp.float32),
    )


def _conv_im2col(w):   # PyTorch Conv2d (O, C, 3, 1) -> (3*C, O); row = tap*C + c
    o, c = w.shape[0], w.shape[1]
    return jnp.transpose(w[:, :, :, 0], (2, 1, 0)).reshape(3 * c, o)


def _conv1x1(w):       # (O, C, 1, 1) -> (C, O)
    return jnp.transpose(w[:, :, 0, 0])


def _lin(w):           # torch Linear (out, in) -> (in, out)
    return jnp.transpose(w)


def build_matmul_params(tp):
    return dict(
        w1r=_conv_im2col(tp["c_r1_w"]), b1r=tp["c_r1_b"],
        w2r=_conv_im2col(tp["c_r2_w"]), b2r=tp["c_r2_b"],
        w3r=_conv1x1(tp["c_r3_w"]),     b3r=tp["c_r3_b"],
        w1o=_conv_im2col(tp["c_o1_w"]), b1o=tp["c_o1_b"],
        w2o=_conv_im2col(tp["c_o2_w"]), b2o=tp["c_o2_b"],
        w3o=_conv1x1(tp["c_o3_w"]),     b3o=tp["c_o3_b"],
        wg1=_lin(tp["g1_w"]), bg1=tp["g1_b"],
        wg2=_lin(tp["g2_w"]), bg2=tp["g2_b"],
        w_a=tp["w_a"], wsa0=tp["wsa0"], wsa1=tp["wsa1"],
        wafc=_lin(tp["afc_w"]), bafc=tp["afc_b"],
        wvw=jnp.concatenate([_lin(tp["av_w"]), _lin(tp["aw_w"])], axis=1),  # (64,2)
        bvw=jnp.concatenate([tp["av_b"], tp["aw_b"]], axis=0),              # (2,)
        wvobs=_lin(tp["vobs_w"]),   bvobs=tp["vobs_b"],
        wvgoal=_lin(tp["vgoal_w"]), bvgoal=tp["vgoal_b"],
        wcrit=_lin(tp["crit_w"]),   bcrit=tp["crit_b"],
        logstd=tp["logstd"],
    )


def pack_params(mm):
    """Pack every weight/bias (+logstd) into one (PARAM_ROWS, 64) f32 slab."""
    blocks = []
    for name, r, c in PARAM_SPEC:
        a = np.asarray(mm[name], dtype=np.float32)
        if a.ndim == 1:
            a = a.reshape(1, -1)
        assert a.shape == (r, c), (name, a.shape, (r, c))
        blk = np.zeros((_round8(r), PARAM_LANES), np.float32)
        blk[:r, :c] = a
        blocks.append(blk)
    slab = np.concatenate(blocks, axis=0)
    assert slab.shape == (PARAM_ROWS, PARAM_LANES)
    return jnp.asarray(slab)


# ------------------------------------ wrapper ------------------------------------
def _pad_seg(a, rows, lanes=DATA_LANES):
    r, c = a.shape
    return jnp.pad(a.astype(jnp.float32), ((0, rows - r), (0, lanes - c)))


@jax.jit
def tcn_gacn_forward(param_slab, state, goal, obs, noise):
    # NCHW -> channels-last, time-major rows (lane = h*C + c) for im2col convs
    xr = jnp.transpose(state[:, :, :, 0], (0, 2, 1)).reshape(B, H_IN * ROBOT_DIM)
    xo = jnp.transpose(obs, (0, 3, 2, 1)).reshape(B * W_OTHER, H_IN * OBS_DIM)
    data = jnp.concatenate(
        [_pad_seg(xr, 8), _pad_seg(xo, 8), _pad_seg(goal, 8), _pad_seg(noise, 8)],
        axis=0)                                                  # (32, 32) slab
    out = pl.pallas_call(
        tcn_gacn_kernel,
        out_shape=jax.ShapeDtypeStruct((B, 6), jnp.float32),
    )(data, param_slab)
    return out[:, 0:1], out[:, 1:3], out[:, 3:4], out[:, 4:6]   # v, action, lp, mean


# ------------------------------ pure-JAX reference ------------------------------
def reference_forward(tp, state, goal, obs, noise):
    def tcn(x_nchw, w1, b1, w2, b2, w3, b3):
        Bc, C, Hh, Wc = x_nchw.shape
        cols = jnp.transpose(x_nchw, (0, 3, 2, 1)).reshape(Bc * Wc, Hh, C)
        t1 = [w1[:, :, d, 0].T for d in range(3)]
        h1 = jnp.stack(
            [jax.nn.relu(sum(cols[:, h + d, :] @ t1[d] for d in range(3)) + b1)
             for h in range(Hh - 2)], axis=1)
        t2 = [w2[:, :, d, 0].T for d in range(3)]
        h2 = jax.nn.relu(sum(h1[:, d, :] @ t2[d] for d in range(3)) + b2)
        h3 = jax.nn.relu(h2 @ w3[:, :, 0, 0].T + b3)
        return h3.reshape(Bc, Wc, 32)

    x1 = tcn(state, tp["c_r1_w"], tp["c_r1_b"], tp["c_r2_w"], tp["c_r2_b"],
             tp["c_r3_w"], tp["c_r3_b"])                          # (B, 1, 32)
    x2 = tcn(obs, tp["c_o1_w"], tp["c_o1_b"], tp["c_o2_w"], tp["c_o2_b"],
             tp["c_o3_w"], tp["c_o3_b"])                          # (B, W_OTHER, 32)
    g = jax.nn.relu(goal @ tp["g1_w"].T + tp["g1_b"])
    x3 = jax.nn.relu(g @ tp["g2_w"].T + tp["g2_b"])[:, None, :]
    X = jnp.concatenate([x1, x3, x2], axis=1)
    H = X
    for wsa in (tp["wsa0"], tp["wsa1"]):
        A = jax.nn.softmax(jnp.einsum('bnd,de,bme->bnm', H, tp["w_a"], H), axis=2)
        H = jax.nn.relu(jnp.einsum('bnm,bmd,de->bne', A, H, wsa))
    a = jax.nn.relu(H[:, 0, :] @ tp["afc_w"].T + tp["afc_b"])
    mean = jnp.concatenate([jax.nn.sigmoid(a @ tp["av_w"].T + tp["av_b"]),
                            jnp.tanh(a @ tp["aw_w"].T + tp["aw_b"])], axis=-1)
    logstd = jnp.broadcast_to(tp["logstd"].reshape(1, -1), mean.shape)
    std = jnp.exp(logstd)
    action = mean + std * noise
    lp = jnp.sum(-(action - mean) ** 2 / (2 * std * std) - 0.5 * LOG_2PI - logstd,
                 axis=-1, keepdims=True)
    goal_v = jnp.concatenate([x1[:, 0, :], x3[:, 0, :]], axis=1)
    v_obs = jax.nn.relu(x1[:, 0, :] @ tp["vobs_w"].T + tp["vobs_b"])  # Hv[:,0,:]==x1
    v_goal = jax.nn.relu(goal_v @ tp["vgoal_w"].T + tp["vgoal_b"])
    v = jnp.concatenate([v_obs, v_goal], axis=1) @ tp["crit_w"].T + tp["crit_b"]
    return v, action, lp, mean


if __name__ == "__main__":
    key = jax.random.PRNGKey(0)
    k_p, k_s, k_g, k_o, k_n = jax.random.split(key, 5)
    tp = init_torch_params(k_p)
    param_slab = pack_params(build_matmul_params(tp))

    state = jax.random.normal(k_s, (B, ROBOT_DIM, H_IN, 1), dtype=jnp.float32)
    goal = jax.random.normal(k_g, (B, GOAL_DIM), dtype=jnp.float32)
    obs = jax.random.normal(k_o, (B, OBS_DIM, H_IN, W_OTHER), dtype=jnp.float32)
    noise = jax.random.normal(k_n, (B, ACTION_DIM), dtype=jnp.float32)

    outs = tcn_gacn_forward(param_slab, state, goal, obs, noise)
    outs = jax.block_until_ready(outs)
    refs = reference_forward(tp, state, goal, obs, noise)
    for got, want in zip(outs, refs):
        np.testing.assert_allclose(np.asarray(got), np.asarray(want),
                                   rtol=1e-4, atol=1e-4)
    print("KERNEL_OK")
</pallas_src>

<mosaic_0001>
module attributes {stable_mosaic.version = 11 : i64} {
  func.func @tcn_gacn_kernel(%arg0: memref<32x32xf32, #tpu.memory_space<vmem>>, %arg1: memref<1080x64xf32, #tpu.memory_space<vmem>>, %arg2: memref<2x6xf32, #tpu.memory_space<vmem>>) attributes {dimension_semantics = [], scalar_prefetch = 0 : i64, scratch_operands = 0 : i64, tpu.core_type = #tpu.core_type<tc>} {
    %c0 = arith.constant 0 : index
    %c0_0 = arith.constant 0 : index
    %0 = vector.load %arg0[%c0, %c0_0] : memref<32x32xf32, #tpu.memory_space<vmem>>, vector<2x20xf32>
    %c8 = arith.constant 8 : index
    %c0_1 = arith.constant 0 : index
    %1 = vector.load %arg0[%c8, %c0_1] : memref<32x32xf32, #tpu.memory_space<vmem>>, vector<6x20xf32>
    %c16 = arith.constant 16 : index
    %c0_2 = arith.constant 0 : index
    %2 = vector.load %arg0[%c16, %c0_2] : memref<32x32xf32, #tpu.memory_space<vmem>>, vector<2x2xf32>
    %c24 = arith.constant 24 : index
    %c0_3 = arith.constant 0 : index
    %3 = vector.load %arg0[%c24, %c0_3] : memref<32x32xf32, #tpu.memory_space<vmem>>, vector<2x2xf32>
    %c0_4 = arith.constant 0 : index
    %c0_5 = arith.constant 0 : index
    %4 = vector.load %arg1[%c0_4, %c0_5] : memref<1080x64xf32, #tpu.memory_space<vmem>>, vector<12x64xf32>
    %c16_6 = arith.constant 16 : index
    %c0_7 = arith.constant 0 : index
    %5 = vector.load %arg1[%c16_6, %c0_7] : memref<1080x64xf32, #tpu.memory_space<vmem>>, vector<1x64xf32>
    %c24_8 = arith.constant 24 : index
    %c0_9 = arith.constant 0 : index
    %6 = vector.load %arg1[%c24_8, %c0_9] : memref<1080x64xf32, #tpu.memory_space<vmem>>, vector<192x32xf32>
    %c216 = arith.constant 216 : index
    %c0_10 = arith.constant 0 : index
    %7 = vector.load %arg1[%c216, %c0_10] : memref<1080x64xf32, #tpu.memory_space<vmem>>, vector<1x32xf32>
    %c224 = arith.constant 224 : index
    %c0_11 = arith.constant 0 : index
    %8 = vector.load %arg1[%c224, %c0_11] : memref<1080x64xf32, #tpu.memory_space<vmem>>, vector<32x32xf32>
    %c256 = arith.constant 256 : index
    %c0_12 = arith.constant 0 : index
    %9 = vector.load %arg1[%c256, %c0_12] : memref<1080x64xf32, #tpu.memory_space<vmem>>, vector<1x32xf32>
    %10 = vector.extract_strided_slice %0 {offsets = [0, 0], sizes = [2, 12], strides = [1, 1]} : vector<2x20xf32> to vector<2x12xf32>
    %cst = arith.constant dense<0.000000e+00> : vector<2x64xf32>
    %11 = tpu.matmul %10, %4, %cst {dimension_numbers = #tpu.dot_dimension_numbers<[1], [0], [0], [1], [0, 0, 1, 1], [], []>} : vector<2x12xf32>, vector<12x64xf32>, vector<2x64xf32> -> vector<2x64xf32>
    %12 = vector.broadcast %5 : vector<1x64xf32> to vector<2x64xf32>
    %13 = arith.addf %11, %12 : vector<2x64xf32>
    %cst_13 = arith.constant 0.000000e+00 : f32
    %14 = vector.broadcast %cst_13 : f32 to vector<2x64xf32>
    %15 = arith.maximumf %13, %14 : vector<2x64xf32>
    %16 = vector.extract_strided_slice %0 {offsets = [0, 4], sizes = [2, 12], strides = [1, 1]} : vector<2x20xf32> to vector<2x12xf32>
    %cst_14 = arith.constant dense<0.000000e+00> : vector<2x64xf32>
    %17 = tpu.matmul %16, %4, %cst_14 {dimension_numbers = #tpu.dot_dimension_numbers<[1], [0], [0], [1], [0, 0, 1, 1], [], []>} : vector<2x12xf32>, vector<12x64xf32>, vector<2x64xf32> -> vector<2x64xf32>
    %18 = vector.broadcast %5 : vector<1x64xf32> to vector<2x64xf32>
    %19 = arith.addf %17, %18 : vector<2x64xf32>
    %cst_15 = arith.constant 0.000000e+00 : f32
    %20 = vector.broadcast %cst_15 : f32 to vector<2x64xf32>
    %21 = arith.maximumf %19, %20 : vector<2x64xf32>
    %22 = vector.extract_strided_slice %0 {offsets = [0, 8], sizes = [2, 12], strides = [1, 1]} : vector<2x20xf32> to vector<2x12xf32>
    %cst_16 = arith.constant dense<0.000000e+00> : vector<2x64xf32>
    %23 = tpu.matmul %22, %4, %cst_16 {dimension_numbers = #tpu.dot_dimension_numbers<[1], [0], [0], [1], [0, 0, 1, 1], [], []>} : vector<2x12xf32>, vector<12x64xf32>, vector<2x64xf32> -> vector<2x64xf32>
    %24 = vector.broadcast %5 : vector<1x64xf32> to vector<2x64xf32>
    %25 = arith.addf %23, %24 : vector<2x64xf32>
    %cst_17 = arith.constant 0.000000e+00 : f32
    %26 = vector.broadcast %cst_17 : f32 to vector<2x64xf32>
    %27 = arith.maximumf %25, %26 : vector<2x64xf32>
    %28 = tpu.concatenate %15, %21, %27 in 1 : vector<2x64xf32>, vector<2x64xf32>, vector<2x64xf32> -> vector<2x192xf32>
    %cst_18 = arith.constant dense<0.000000e+00> : vector<2x32xf32>
    %29 = tpu.matmul %28, %6, %cst_18 {dimension_numbers = #tpu.dot_dimension_numbers<[1], [0], [0], [1], [0, 0, 1, 1], [], []>} : vector<2x192xf32>, vector<192x32xf32>, vector<2x32xf32> -> vector<2x32xf32>
    %30 = vector.broadcast %7 : vector<1x32xf32> to vector<2x32xf32>
    %31 = arith.addf %29, %30 : vector<2x32xf32>
    %cst_19 = arith.constant 0.000000e+00 : f32
    %32 = vector.broadcast %cst_19 : f32 to vector<2x32xf32>
    %33 = arith.maximumf %31, %32 : vector<2x32xf32>
    %cst_20 = arith.constant dense<0.000000e+00> : vector<2x32xf32>
    %34 = tpu.matmul %33, %8, %cst_20 {dimension_numbers = #tpu.dot_dimension_numbers<[1], [0], [0], [1], [0, 0, 1, 1], [], []>} : vector<2x32xf32>, vector<32x32xf32>, vector<2x32xf32> -> vector<2x32xf32>
    %35 = vector.broadcast %9 : vector<1x32xf32> to vector<2x32xf32>
    %36 = arith.addf %34, %35 : vector<2x32xf32>
    %cst_21 = arith.constant 0.000000e+00 : f32
    %37 = vector.broadcast %cst_21 : f32 to vector<2x32xf32>
    %38 = arith.maximumf %36, %37 : vector<2x32xf32>
    %c264 = arith.constant 264 : index
    %c0_22 = arith.constant 0 : index
    %39 = vector.load %arg1[%c264, %c0_22] : memref<1080x64xf32, #tpu.memory_space<vmem>>, vector<12x64xf32>
    %c280 = arith.constant 280 : index
    %c0_23 = arith.constant 0 : index
    %40 = vector.load %arg1[%c280, %c0_23] : memref<1080x64xf32, #tpu.memory_space<vmem>>, vector<1x64xf32>
    %c288 = arith.constant 288 : index
    %c0_24 = arith.constant 0 : index
    %41 = vector.load %arg1[%c288, %c0_24] : memref<1080x64xf32, #tpu.memory_space<vmem>>, vector<192x32xf32>
    %c480 = arith.constant 480 : index
    %c0_25 = arith.constant 0 : index
    %42 = vector.load %arg1[%c480, %c0_25] : memref<1080x64xf32, #tpu.memory_space<vmem>>, vector<1x32xf32>
    %c488 = arith.constant 488 : index
    %c0_26 = arith.constant 0 : index
    %43 = vector.load %arg1[%c488, %c0_26] : memref<1080x64xf32, #tpu.memory_space<vmem>>, vector<32x32xf32>
    %c520 = arith.constant 520 : index
    %c0_27 = arith.constant 0 : index
    %44 = vector.load %arg1[%c520, %c0_27] : memref<1080x64xf32, #tpu.memory_space<vmem>>, vector<1x32xf32>
    %45 = vector.extract_strided_slice %1 {offsets = [0, 0], sizes = [6, 12], strides = [1, 1]} : vector<6x20xf32> to vector<6x12xf32>
    %cst_28 = arith.constant dense<0.000000e+00> : vector<6x64xf32>
    %46 = tpu.matmul %45, %39, %cst_28 {dimension_numbers = #tpu.dot_dimension_numbers<[1], [0], [0], [1], [0, 0, 1, 1], [], []>} : vector<6x12xf32>, vector<12x64xf32>, vector<6x64xf32> -> vector<6x64xf32>
    %47 = vector.broadcast %40 : vector<1x64xf32> to vector<6x64xf32>
    %48 = arith.addf %46, %47 : vector<6x64xf32>
    %cst_29 = arith.constant 0.000000e+00 : f32
    %49 = vector.broadcast %cst_29 : f32 to vector<6x64xf32>
    %50 = arith.maximumf %48, %49 : vector<6x64xf32>
    %51 = vector.extract_strided_slice %1 {offsets = [0, 4], sizes = [6, 12], strides = [1, 1]} : vector<6x20xf32> to vector<6x12xf32>
    %cst_30 = arith.constant dense<0.000000e+00> : vector<6x64xf32>
    %52 = tpu.matmul %51, %39, %cst_30 {dimension_numbers = #tpu.dot_dimension_numbers<[1], [0], [0], [1], [0, 0, 1, 1], [], []>} : vector<6x12xf32>, vector<12x64xf32>, vector<6x64xf32> -> vector<6x64xf32>
    %53 = vector.broadcast %40 : vector<1x64xf32> to vector<6x64xf32>
    %54 = arith.addf %52, %53 : vector<6x64xf32>
    %cst_31 = arith.constant 0.000000e+00 : f32
    %55 = vector.broadcast %cst_31 : f32 to vector<6x64xf32>
    %56 = arith.maximumf %54, %55 : vector<6x64xf32>
    %57 = vector.extract_strided_slice %1 {offsets = [0, 8], sizes = [6, 12], strides = [1, 1]} : vector<6x20xf32> to vector<6x12xf32>
    %cst_32 = arith.constant dense<0.000000e+00> : vector<6x64xf32>
    %58 = tpu.matmul %57, %39, %cst_32 {dimension_numbers = #tpu.dot_dimension_numbers<[1], [0], [0], [1], [0, 0, 1, 1], [], []>} : vector<6x12xf32>, vector<12x64xf32>, vector<6x64xf32> -> vector<6x64xf32>
    %59 = vector.broadcast %40 : vector<1x64xf32> to vector<6x64xf32>
    %60 = arith.addf %58, %59 : vector<6x64xf32>
    %cst_33 = arith.constant 0.000000e+00 : f32
    %61 = vector.broadcast %cst_33 : f32 to vector<6x64xf32>
    %62 = arith.maximumf %60, %61 : vector<6x64xf32>
    %63 = tpu.concatenate %50, %56, %62 in 1 : vector<6x64xf32>, vector<6x64xf32>, vector<6x64xf32> -> vector<6x192xf32>
    %cst_34 = arith.constant dense<0.000000e+00> : vector<6x32xf32>
    %64 = tpu.matmul %63, %41, %cst_34 {dimension_numbers = #tpu.dot_dimension_numbers<[1], [0], [0], [1], [0, 0, 1, 1], [], []>} : vector<6x192xf32>, vector<192x32xf32>, vector<6x32xf32> -> vector<6x32xf32>
    %65 = vector.broadcast %42 : vector<1x32xf32> to vector<6x32xf32>
    %66 = arith.addf %64, %65 : vector<6x32xf32>
    %cst_35 = arith.constant 0.000000e+00 : f32
    %67 = vector.broadcast %cst_35 : f32 to vector<6x32xf32>
    %68 = arith.maximumf %66, %67 : vector<6x32xf32>
    %cst_36 = arith.constant dense<0.000000e+00> : vector<6x32xf32>
    %69 = tpu.matmul %68, %43, %cst_36 {dimension_numbers = #tpu.dot_dimension_numbers<[1], [0], [0], [1], [0, 0, 1, 1], [], []>} : vector<6x32xf32>, vector<32x32xf32>, vector<6x32xf32> -> vector<6x32xf32>
    %70 = vector.broadcast %44 : vector<1x32xf32> to vector<6x32xf32>
    %71 = arith.addf %69, %70 : vector<6x32xf32>
    %cst_37 = arith.constant 0.000000e+00 : f32
    %72 = vector.broadcast %cst_37 : f32 to vector<6x32xf32>
    %73 = arith.maximumf %71, %72 : vector<6x32xf32>
    %c528 = arith.constant 528 : index
    %c0_38 = arith.constant 0 : index
    %74 = vector.load %arg1[%c528, %c0_38] : memref<1080x64xf32, #tpu.memory_space<vmem>>, vector<2x64xf32>
    %cst_39 = arith.constant dense<0.000000e+00> : vector<2x64xf32>
    %75 = tpu.matmul %2, %74, %cst_39 {dimension_numbers = #tpu.dot_dimension_numbers<[1], [0], [0], [1], [0, 0, 1, 1], [], []>} : vector<2x2xf32>, vector<2x64xf32>, vector<2x64xf32> -> vector<2x64xf32>
    %c536 = arith.constant 536 : index
    %c0_40 = arith.constant 0 : index
    %76 = vector.load %arg1[%c536, %c0_40] : memref<1080x64xf32, #tpu.memory_space<vmem>>, vector<1x64xf32>
    %77 = vector.broadcast %76 : vector<1x64xf32> to vector<2x64xf32>
    %78 = arith.addf %75, %77 : vector<2x64xf32>
    %cst_41 = arith.constant 0.000000e+00 : f32
    %79 = vector.broadcast %cst_41 : f32 to vector<2x64xf32>
    %80 = arith.maximumf %78, %79 : vector<2x64xf32>
    %c544 = arith.constant 544 : index
    %c0_42 = arith.constant 0 : index
    %81 = vector.load %arg1[%c544, %c0_42] : memref<1080x64xf32, #tpu.memory_space<vmem>>, vector<64x32xf32>
    %cst_43 = arith.constant dense<0.000000e+00> : vector<2x32xf32>
    %82 = tpu.matmul %80, %81, %cst_43 {dimension_numbers = #tpu.dot_dimension_numbers<[1], [0], [0], [1], [0, 0, 1, 1], [], []>} : vector<2x64xf32>, vector<64x32xf32>, vector<2x32xf32> -> vector<2x32xf32>
    %c608 = arith.constant 608 : index
    %c0_44 = arith.constant 0 : index
    %83 = vector.load %arg1[%c608, %c0_44] : memref<1080x64xf32, #tpu.memory_space<vmem>>, vector<1x32xf32>
    %84 = vector.broadcast %83 : vector<1x32xf32> to vector<2x32xf32>
    %85 = arith.addf %82, %84 : vector<2x32xf32>
    %cst_45 = arith.constant 0.000000e+00 : f32
    %86 = vector.broadcast %cst_45 : f32 to vector<2x32xf32>
    %87 = arith.maximumf %85, %86 : vector<2x32xf32>
    %88 = tpu.concatenate %38, %87, %73 in 0 : vector<2x32xf32>, vector<2x32xf32>, vector<6x32xf32> -> vector<10x32xf32>
    %89 = tpu.iota {dimensions = array<i32: 0>} : vector<10x10xi32>
    %90 = tpu.iota {dimensions = array<i32: 1>} : vector<10x10xi32>
    %c0_i32 = arith.constant 0 : i32
    %91 = vector.broadcast %c0_i32 : i32 to vector<10x10xi32>
    %c1_i32 = arith.constant 1 : i32
    %92 = vector.broadcast %c1_i32 : i32 to vector<10x10xi32>
    %93 = arith.cmpi eq, %89, %92 : vector<10x10xi32>
    %c3_i32 = arith.constant 3 : i32
    %94 = vector.broadcast %c3_i32 : i32 to vector<10x10xi32>
    %95 = arith.cmpi eq, %89, %94 : vector<10x10xi32>
    %96 = arith.ori %93, %95 : vector<10x10xi1>
    %c7_i32 = arith.constant 7 : i32
    %97 = vector.broadcast %c7_i32 : i32 to vector<10x10xi32>
    %98 = arith.cmpi sge, %89, %97 : vector<10x10xi32>
    %c10_i32 = arith.constant 10 : i32
    %99 = vector.broadcast %c10_i32 : i32 to vector<10x10xi32>
    %100 = arith.cmpi slt, %89, %99 : vector<10x10xi32>
    %101 = arith.andi %98, %100 : vector<10x10xi1>
    %102 = arith.ori %96, %101 : vector<10x10xi1>
    %c1_i32_46 = arith.constant 1 : i32
    %103 = vector.broadcast %c1_i32_46 : i32 to vector<10x10xi32>
    %104 = arith.select %102, %103, %91 : vector<10x10xi1>, vector<10x10xi32>
    %c0_i32_47 = arith.constant 0 : i32
    %105 = vector.broadcast %c0_i32_47 : i32 to vector<10x10xi32>
    %c1_i32_48 = arith.constant 1 : i32
    %106 = vector.broadcast %c1_i32_48 : i32 to vector<10x10xi32>
    %107 = arith.cmpi eq, %90, %106 : vector<10x10xi32>
    %c3_i32_49 = arith.constant 3 : i32
    %108 = vector.broadcast %c3_i32_49 : i32 to vector<10x10xi32>
    %109 = arith.cmpi eq, %90, %108 : vector<10x10xi32>
    %110 = arith.ori %107, %109 : vector<10x10xi1>
    %c7_i32_50 = arith.constant 7 : i32
    %111 = vector.broadcast %c7_i32_50 : i32 to vector<10x10xi32>
    %112 = arith.cmpi sge, %90, %111 : vector<10x10xi32>
    %c10_i32_51 = arith.constant 10 : i32
    %113 = vector.broadcast %c10_i32_51 : i32 to vector<10x10xi32>
    %114 = arith.cmpi slt, %90, %113 : vector<10x10xi32>
    %115 = arith.andi %112, %114 : vector<10x10xi1>
    %116 = arith.ori %110, %115 : vector<10x10xi1>
    %c1_i32_52 = arith.constant 1 : i32
    %117 = vector.broadcast %c1_i32_52 : i32 to vector<10x10xi32>
    %118 = arith.select %116, %117, %105 : vector<10x10xi1>, vector<10x10xi32>
    %119 = arith.cmpi eq, %104, %118 : vector<10x10xi32>
    %cst_53 = arith.constant 0.000000e+00 : f32
    %cst_54 = arith.constant -1.000000e+30 : f32
    %120 = vector.broadcast %cst_53 : f32 to vector<10x10xf32>
    %121 = vector.broadcast %cst_54 : f32 to vector<10x10xf32>
    %122 = arith.select %119, %120, %121 : vector<10x10xi1>, vector<10x10xf32>
    %c616 = arith.constant 616 : index
    %c0_55 = arith.constant 0 : index
    %123 = vector.load %arg1[%c616, %c0_55] : memref<1080x64xf32, #tpu.memory_space<vmem>>, vector<32x32xf32>
    %cst_56 = arith.constant dense<0.000000e+00> : vector<10x32xf32>
    %124 = tpu.matmul %88, %123, %cst_56 {dimension_numbers = #tpu.dot_dimension_numbers<[1], [0], [0], [1], [0, 0, 1, 1], [], []>} : vector<10x32xf32>, vector<32x32xf32>, vector<10x32xf32> -> vector<10x32xf32>
    %cst_57 = arith.constant dense<0.000000e+00> : vector<10x10xf32>
    %125 = tpu.matmul %124, %88, %cst_57 {dimension_numbers = #tpu.dot_dimension_numbers<[1], [1], [0], [0], [0, 0, 1, 0], [], []>} : vector<10x32xf32>, vector<10x32xf32>, vector<10x10xf32> -> vector<10x10xf32>
    %126 = arith.addf %125, %122 : vector<10x10xf32>
    %cst_58 = arith.constant dense<0xFF800000> : vector<10xf32>
    %127 = vector.multi_reduction <maximumf>, %126, %cst_58 [1] : vector<10x10xf32> to vector<10xf32>
    %128 = vector.shape_cast %127 : vector<10xf32> to vector<10x1xf32>
    %129 = vector.broadcast %128 : vector<10x1xf32> to vector<10x10xf32>
    %130 = arith.subf %126, %129 : vector<10x10xf32>
    %131 = math.exp %130 : vector<10x10xf32>
    %cst_59 = arith.constant dense<0.000000e+00> : vector<10xf32>
    %132 = vector.multi_reduction <add>, %131, %cst_59 [1] : vector<10x10xf32> to vector<10xf32>
    %133 = vector.shape_cast %132 : vector<10xf32> to vector<10x1xf32>
    %134 = tpu.reciprocal %133 : vector<10x1xf32> -> vector<10x1xf32>
    %135 = vector.broadcast %134 : vector<10x1xf32> to vector<10x10xf32>
    %136 = arith.mulf %131, %135 : vector<10x10xf32>
    %cst_60 = arith.constant dense<0.000000e+00> : vector<10x32xf32>
    %137 = tpu.matmul %136, %88, %cst_60 {dimension_numbers = #tpu.dot_dimension_numbers<[1], [0], [0], [1], [0, 0, 1, 1], [], []>} : vector<10x10xf32>, vector<10x32xf32>, vector<10x32xf32> -> vector<10x32xf32>
    %c648 = arith.constant 648 : index
    %c0_61 = arith.constant 0 : index
    %138 = vector.load %arg1[%c648, %c0_61] : memref<1080x64xf32, #tpu.memory_space<vmem>>, vector<32x32xf32>
    %cst_62 = arith.constant dense<0.000000e+00> : vector<10x32xf32>
    %139 = tpu.matmul %137, %138, %cst_62 {dimension_numbers = #tpu.dot_dimension_numbers<[1], [0], [0], [1], [0, 0, 1, 1], [], []>} : vector<10x32xf32>, vector<32x32xf32>, vector<10x32xf32> -> vector<10x32xf32>
    %cst_63 = arith.constant 0.000000e+00 : f32
    %140 = vector.broadcast %cst_63 : f32 to vector<10x32xf32>
    %141 = arith.maximumf %139, %140 : vector<10x32xf32>
    %cst_64 = arith.constant dense<0.000000e+00> : vector<10x32xf32>
    %142 = tpu.matmul %141, %123, %cst_64 {dimension_numbers = #tpu.dot_dimension_numbers<[1], [0], [0], [1], [0, 0, 1, 1], [], []>} : vector<10x32xf32>, vector<32x32xf32>, vector<10x32xf32> -> vector<10x32xf32>
    %cst_65 = arith.constant dense<0.000000e+00> : vector<10x10xf32>
    %143 = tpu.matmul %142, %141, %cst_65 {dimension_numbers = #tpu.dot_dimension_numbers<[1], [1], [0], [0], [0, 0, 1, 0], [], []>} : vector<10x32xf32>, vector<10x32xf32>, vector<10x10xf32> -> vector<10x10xf32>
    %144 = arith.addf %143, %122 : vector<10x10xf32>
    %cst_66 = arith.constant dense<0xFF800000> : vector<10xf32>
    %145 = vector.multi_reduction <maximumf>, %144, %cst_66 [1] : vector<10x10xf32> to vector<10xf32>
    %146 = vector.shape_cast %145 : vector<10xf32> to vector<10x1xf32>
    %147 = vector.broadcast %146 : vector<10x1xf32> to vector<10x10xf32>
    %148 = arith.subf %144, %147 : vector<10x10xf32>
    %149 = math.exp %148 : vector<10x10xf32>
    %cst_67 = arith.constant dense<0.000000e+00> : vector<10xf32>
    %150 = vector.multi_reduction <add>, %149, %cst_67 [1] : vector<10x10xf32> to vector<10xf32>
    %151 = vector.shape_cast %150 : vector<10xf32> to vector<10x1xf32>
    %152 = tpu.reciprocal %151 : vector<10x1xf32> -> vector<10x1xf32>
    %153 = vector.broadcast %152 : vector<10x1xf32> to vector<10x10xf32>
    %154 = arith.mulf %149, %153 : vector<10x10xf32>
    %cst_68 = arith.constant dense<0.000000e+00> : vector<10x32xf32>
    %155 = tpu.matmul %154, %141, %cst_68 {dimension_numbers = #tpu.dot_dimension_numbers<[1], [0], [0], [1], [0, 0, 1, 1], [], []>} : vector<10x10xf32>, vector<10x32xf32>, vector<10x32xf32> -> vector<10x32xf32>
    %c680 = arith.constant 680 : index
    %c0_69 = arith.constant 0 : index
    %156 = vector.load %arg1[%c680, %c0_69] : memref<1080x64xf32, #tpu.memory_space<vmem>>, vector<32x32xf32>
    %cst_70 = arith.constant dense<0.000000e+00> : vector<10x32xf32>
    %157 = tpu.matmul %155, %156, %cst_70 {dimension_numbers = #tpu.dot_dimension_numbers<[1], [0], [0], [1], [0, 0, 1, 1], [], []>} : vector<10x32xf32>, vector<32x32xf32>, vector<10x32xf32> -> vector<10x32xf32>
    %cst_71 = arith.constant 0.000000e+00 : f32
    %158 = vector.broadcast %cst_71 : f32 to vector<10x32xf32>
    %159 = arith.maximumf %157, %158 : vector<10x32xf32>
    %160 = vector.extract_strided_slice %159 {offsets = [0, 0], sizes = [2, 32], strides = [1, 1]} : vector<10x32xf32> to vector<2x32xf32>
    %c712 = arith.constant 712 : index
    %c0_72 = arith.constant 0 : index
    %161 = vector.load %arg1[%c712, %c0_72] : memref<1080x64xf32, #tpu.memory_space<vmem>>, vector<32x64xf32>
    %cst_73 = arith.constant dense<0.000000e+00> : vector<2x64xf32>
    %162 = tpu.matmul %160, %161, %cst_73 {dimension_numbers = #tpu.dot_dimension_numbers<[1], [0], [0], [1], [0, 0, 1, 1], [], []>} : vector<2x32xf32>, vector<32x64xf32>, vector<2x64xf32> -> vector<2x64xf32>
    %c744 = arith.constant 744 : index
    %c0_74 = arith.constant 0 : index
    %163 = vector.load %arg1[%c744, %c0_74] : memref<1080x64xf32, #tpu.memory_space<vmem>>, vector<1x64xf32>
    %164 = vector.broadcast %163 : vector<1x64xf32> to vector<2x64xf32>
    %165 = arith.addf %162, %164 : vector<2x64xf32>
    %cst_75 = arith.constant 0.000000e+00 : f32
    %166 = vector.broadcast %cst_75 : f32 to vector<2x64xf32>
    %167 = arith.maximumf %165, %166 : vector<2x64xf32>
    %c752 = arith.constant 752 : index
    %c0_76 = arith.constant 0 : index
    %168 = vector.load %arg1[%c752, %c0_76] : memref<1080x64xf32, #tpu.memory_space<vmem>>, vector<64x2xf32>
    %cst_77 = arith.constant dense<0.000000e+00> : vector<2x2xf32>
    %169 = tpu.matmul %167, %168, %cst_77 {dimension_numbers = #tpu.dot_dimension_numbers<[1], [0], [0], [1], [0, 0, 1, 1], [], []>} : vector<2x64xf32>, vector<64x2xf32>, vector<2x2xf32> -> vector<2x2xf32>
    %c816 = arith.constant 816 : index
    %c0_78 = arith.constant 0 : index
    %170 = vector.load %arg1[%c816, %c0_78] : memref<1080x64xf32, #tpu.memory_space<vmem>>, vector<1x2xf32>
    %171 = vector.broadcast %170 : vector<1x2xf32> to vector<2x2xf32>
    %172 = arith.addf %169, %171 : vector<2x2xf32>
    %173 = tpu.iota {dimensions = array<i32: 1>} : vector<2x2xi32>
    %c0_i32_79 = arith.constant 0 : i32
    %174 = vector.broadcast %c0_i32_79 : i32 to vector<2x2xi32>
    %175 = arith.cmpi eq, %173, %174 : vector<2x2xi32>
    %176 = arith.negf %172 : vector<2x2xf32>
    %177 = math.exp %176 : vector<2x2xf32>
    %cst_80 = arith.constant 1.000000e+00 : f32
    %178 = vector.broadcast %cst_80 : f32 to vector<2x2xf32>
    %179 = arith.addf %178, %177 : vector<2x2xf32>
    %180 = arith.divf %178, %179 : vector<2x2xf32>
    %181 = math.tanh %172 : vector<2x2xf32>
    %182 = arith.select %175, %180, %181 : vector<2x2xi1>, vector<2x2xf32>
    %c1072 = arith.constant 1072 : index
    %c0_81 = arith.constant 0 : index
    %183 = vector.load %arg1[%c1072, %c0_81] : memref<1080x64xf32, #tpu.memory_space<vmem>>, vector<1x2xf32>
    %184 = vector.shape_cast %183 : vector<1x2xf32> to vector<1x2xf32>
    %185 = vector.broadcast %184 : vector<1x2xf32> to vector<2x2xf32>
    %186 = math.exp %185 : vector<2x2xf32>
    %187 = arith.mulf %186, %3 : vector<2x2xf32>
    %188 = arith.addf %182, %187 : vector<2x2xf32>
    %189 = arith.subf %188, %182 : vector<2x2xf32>
    %190 = arith.mulf %189, %189 : vector<2x2xf32>
    %cst_82 = arith.constant 0.000000e+00 : f32
    %191 = vector.broadcast %cst_82 : f32 to vector<2x2xf32>
    %192 = arith.subf %191, %190 : vector<2x2xf32>
    %cst_83 = arith.constant 2.000000e+00 : f32
    %193 = vector.broadcast %cst_83 : f32 to vector<2x2xf32>
    %194 = arith.mulf %193, %186 : vector<2x2xf32>
    %195 = arith.mulf %194, %186 : vector<2x2xf32>
    %196 = arith.divf %192, %195 : vector<2x2xf32>
    %cst_84 = arith.constant 0.918938517 : f32
    %197 = vector.broadcast %cst_84 : f32 to vector<2x2xf32>
    %198 = arith.subf %196, %197 : vector<2x2xf32>
    %199 = arith.subf %198, %185 : vector<2x2xf32>
    %cst_85 = arith.constant dense<0.000000e+00> : vector<2xf32>
    %200 = vector.multi_reduction <add>, %199, %cst_85 [1] : vector<2x2xf32> to vector<2xf32>
    %201 = vector.shape_cast %200 : vector<2xf32> to vector<2x1xf32>
    %c824 = arith.constant 824 : index
    %c0_86 = arith.constant 0 : index
    %202 = vector.load %arg1[%c824, %c0_86] : memref<1080x64xf32, #tpu.memory_space<vmem>>, vector<32x64xf32>
    %cst_87 = arith.constant dense<0.000000e+00> : vector<2x64xf32>
    %203 = tpu.matmul %38, %202, %cst_87 {dimension_numbers = #tpu.dot_dimension_numbers<[1], [0], [0], [1], [0, 0, 1, 1], [], []>} : vector<2x32xf32>, vector<32x64xf32>, vector<2x64xf32> -> vector<2x64xf32>
    %c856 = arith.constant 856 : index
    %c0_88 = arith.constant 0 : index
    %204 = vector.load %arg1[%c856, %c0_88] : memref<1080x64xf32, #tpu.memory_space<vmem>>, vector<1x64xf32>
    %205 = vector.broadcast %204 : vector<1x64xf32> to vector<2x64xf32>
    %206 = arith.addf %203, %205 : vector<2x64xf32>
    %cst_89 = arith.constant 0.000000e+00 : f32
    %207 = vector.broadcast %cst_89 : f32 to vector<2x64xf32>
    %208 = arith.maximumf %206, %207 : vector<2x64xf32>
    %209 = tpu.concatenate %38, %87 in 1 : vector<2x32xf32>, vector<2x32xf32> -> vector<2x64xf32>
    %c864 = arith.constant 864 : index
    %c0_90 = arith.constant 0 : index
    %210 = vector.load %arg1[%c864, %c0_90] : memref<1080x64xf32, #tpu.memory_space<vmem>>, vector<64x64xf32>
    %cst_91 = arith.constant dense<0.000000e+00> : vector<2x64xf32>
    %211 = tpu.matmul %209, %210, %cst_91 {dimension_numbers = #tpu.dot_dimension_numbers<[1], [0], [0], [1], [0, 0, 1, 1], [], []>} : vector<2x64xf32>, vector<64x64xf32>, vector<2x64xf32> -> vector<2x64xf32>
    %c928 = arith.constant 928 : index
    %c0_92 = arith.constant 0 : index
    %212 = vector.load %arg1[%c928, %c0_92] : memref<1080x64xf32, #tpu.memory_space<vmem>>, vector<1x64xf32>
    %213 = vector.broadcast %212 : vector<1x64xf32> to vector<2x64xf32>
    %214 = arith.addf %211, %213 : vector<2x64xf32>
    %cst_93 = arith.constant 0.000000e+00 : f32
    %215 = vector.broadcast %cst_93 : f32 to vector<2x64xf32>
    %216 = arith.maximumf %214, %215 : vector<2x64xf32>
    %217 = tpu.concatenate %208, %216 in 1 : vector<2x64xf32>, vector<2x64xf32> -> vector<2x128xf32>
    %c936 = arith.constant 936 : index
    %c0_94 = arith.constant 0 : index
    %218 = vector.load %arg1[%c936, %c0_94] : memref<1080x64xf32, #tpu.memory_space<vmem>>, vector<128x1xf32>
    %cst_95 = arith.constant dense<0.000000e+00> : vector<2x1xf32>
    %219 = tpu.matmul %217, %218, %cst_95 {dimension_numbers = #tpu.dot_dimension_numbers<[1], [0], [0], [1], [0, 0, 1, 1], [], []>} : vector<2x128xf32>, vector<128x1xf32>, vector<2x1xf32> -> vector<2x1xf32>
    %c1064 = arith.constant 1064 : index
    %c0_96 = arith.constant 0 : index
    %220 = vector.load %arg1[%c1064, %c0_96] : memref<1080x64xf32, #tpu.memory_space<vmem>>, vector<1x1xf32>
    %221 = vector.broadcast %220 : vector<1x1xf32> to vector<2x1xf32>
    %222 = arith.addf %219, %221 : vector<2x1xf32>
    %223 = tpu.concatenate %222, %188, %201, %182 in 1 : vector<2x1xf32>, vector<2x2xf32>, vector<2x1xf32>, vector<2x2xf32> -> vector<2x6xf32>
    %c0_97 = arith.constant 0 : index
    %c0_98 = arith.constant 0 : index
    %224 = vector.load %arg2[%c0_97, %c0_98] : memref<2x6xf32, #tpu.memory_space<vmem>>, vector<2x6xf32>
    tpu.vector_store %arg2[%c0_97, %c0_98], %223 {strides = array<i32>} : memref<2x6xf32, #tpu.memory_space<vmem>>, vector<2x6xf32>,
    return
  }
}

</mosaic_0001>

<bundles_post_ra>
// kernel: tcn_gacn_forward.1
= control target key start
LH: loop header
LB: loop body
LE: loop exit
PB: predicated region body
PF: predicated region fallthrough
CT: control target
= control target key end

     0   :  { %vm56_vm0 = vcmask 1043456   ;;  %v2759_v1 = vmov 0.0   ;;  %vm3461_vm1 = vmmov 0   ;;  %s2761_s15 = smov 124   ;;  %s2762_s16 = smov 120   ;;  %vm52_vm2 = vcmask 97280   ;;  %s3457_s0 = inlined_call_operand.vmem [shape: f32[32,32], index: 0, kind: input, shape index: {}]   ;;  %s3458_s1 = inlined_call_operand.vmem [shape: f32[1080,64], index: 1, kind: input, shape index: {}]   ;;  %s3459_s2 = inlined_call_operand.vmem [shape: f32[2,6], index: 2, kind: output, shape index: {}]  }
   0x1   :  { %v11_v0 = vld [vmem:[%s3457_s0] sm:$0x3]  ;;  %2475 = vmatprep.subr.mxu1 %v2759_v1  ;;  %v16_v2 = vld [vmem:[%s3458_s1 + $0x8] sm:$0xf]  ;;  %2479 = vmatprep.mubr.msk.f32.mxu1 %vm3461_vm1, %v2759_v1  ;;  %v33_v6 = vld [vmem:[%s3458_s1 + $0x90] sm:$0xff]  ;;  %vm3460_vm3 = vcmask 523264  }
   0x2   :  { %v15_v3 = vld [vmem:[%s3458_s1] sm:$0xff]  ;;  %131 = vrot.lane.b32.xlu0 %v11_v0, %s2761_s15  ;;  %2476 = vmatpush3.msk.msra.mxu1 %vm56_vm0, %v16_v2  ;;  %v32_v7 = vld [vmem:[%s3458_s1 + $0x88] sm:$0xff]  ;;  %v30_v9 = vld [vmem:[%s3458_s1 + $0x78] sm:$0xff]  ;;  %vm3463_vm4 = vcmask 1041408   ;;  %vm875_vm5 = vcmask 15360   ;;  %vm369_vm6 = vcmask 261120  }
   0x3   :  { %2477 = vmatprep.subr.mxu1 %v2759_v1  ;;  %2468 = vmatprep.subr.mxu0 %v2759_v1  ;;  %v31_v8 = vld [vmem:[%s3458_s1 + $0x80] sm:$0xff]  ;;  %v29_v10 = vld [vmem:[%s3458_s1 + $0x70] sm:$0xff]  ;;  %v28_v11 = vld [vmem:[%s3458_s1 + $0x68] sm:$0xff]  ;;  %s2766_s26 = smov 32   ;;  %s2767_s19 = smov 1  }
   0x4   :  { %2478 = vmatpush3.msra.mxu1 %v15_v3  ;;  %2469 = vmatpush3.msk.msra.mxu0 %vm56_vm0, %v16_v2  ;;  %v27_v12 = vld [vmem:[%s3458_s1 + $0x60] sm:$0xff]  ;;  %v26_v13 = vld [vmem:[%s3458_s1 + $0x58] sm:$0xff]  ;;  %v25_v15 = vld [vmem:[%s3458_s1 + $0x50] sm:$0xff]  ;;  %s2768_s20 = smov 4  }
   0x5   :  { %2470 = vmatprep.subr.mxu0 %v2759_v1  ;;  %2472 = vmatprep.mubr.msk.f32.mxu0 %vm3461_vm1, %v2759_v1  ;;  %v24_v17 = vld [vmem:[%s3458_s1 + $0x48] sm:$0xff]  ;;  %v23_v18 = vld [vmem:[%s3458_s1 + $0x40] sm:$0xff]  ;;  %v22_v19 = vld [vmem:[%s3458_s1 + $0x38] sm:$0xff] }
   0x6   :  { %206 = vrot.lane.b32.xlu0 %v11_v0, %s2762_s16  ;;  %2471 = vmatpush3.msra.mxu0 %v15_v3  ;;  %v21_v20 = vld [vmem:[%s3458_s1 + $0x30] sm:$0xff]  ;;  %v20_v21 = vld [vmem:[%s3458_s1 + $0x28] sm:$0xff]  ;;  %v19_v22 = vld [vmem:[%s3458_s1 + $0x20] sm:$0xff] }
   0x7   :  { %2473 = vmatmul.mubr.msk.f32.vlgmr.msra.gmra.mxu0 %vm52_vm2, %v11_v0  ;;  %2482 = vmatprep.subr.mxu0 %v2759_v1  ;;  %v18_v23 = vld [vmem:[%s3458_s1 + $0x18] sm:$0xff]  ;;  %v41_v24 = vld [vmem:[%s3458_s1 + $0xd0] sm:$0xff]  ;;  %v40_v25 = vld [vmem:[%s3458_s1 + $0xc8] sm:$0xff] }
   0x8   :  { %2483 = vmatpush3.msk.msra.mxu0 %vm56_vm0, %v16_v2  ;;  %2486 = vmatprep.mubr.msk.f32.mxu0 %vm3461_vm1, %v2759_v1  ;;  %v39_v26 = vld [vmem:[%s3458_s1 + $0xc0] sm:$0xff]  ;;  %v38_v27 = vld [vmem:[%s3458_s1 + $0xb8] sm:$0xff]  ;;  %v37_v28 = vld [vmem:[%s3458_s1 + $0xb0] sm:$0xff] }
   0x9   :  { %2484 = vmatprep.subr.mxu0 %v2759_v1  ;;  %294 = vmatprep.subr.mxu1 %v2759_v1  ;;  %v36_v29 = vld [vmem:[%s3458_s1 + $0xa8] sm:$0xff]  ;;  %v35_v30 = vld [vmem:[%s3458_s1 + $0xa0] sm:$0xff]  ;;  %v34_v31 = vld [vmem:[%s3458_s1 + $0x98] sm:$0xff] }
   0xa   :  { %2485 = vmatpush3.msra.mxu0 %v15_v3  ;;  %v2918_v32 = vld [vmem:[%s3457_s0 + $0x8] sm:$0x3f]  ;;  %v2283_v33 = vld [vmem:[%s3458_s1 + $0x10] ss:$0 sm:$0xff]  ;;  %v46_v35 = vld [vmem:[%s3458_s1 + $0xf8] sm:$0xff] }
   0xb   :  { %2489 = vmatprep.subr.mxu0 %v2759_v1  ;;  %633 = vrot.lane.b32.xlu0 %v2918_v32, %s2762_s16  ;;  %v45_v38 = vld [vmem:[%s3458_s1 + $0xf0] sm:$0xff]  ;;  %s2763_s16 = smov 64   ;;  %v961_v50 = vld [vmem:[%s3458_s1 + $0x258] sm:$0xff]  ;;  %v959_v52 = vld [vmem:[%s3458_s1 + $0x248] sm:$0xff] }
   0xc   :  { %v869_v47 = vld [vmem:[%s3458_s1 + $0x210] sm:$0x3]  ;;  %v958_v53 = vld [vmem:[%s3458_s1 + $0x240] sm:$0xff]  ;;  %v44_v54 = vld [vmem:[%s3458_s1 + $0xe8] sm:$0xff] }
   0xd   :  { %v13_v49 = vld [vmem:[%s3457_s0 + $0x10] sm:$0x3]  ;;  %v957_v55 = vld [vmem:[%s3458_s1 + $0x238] sm:$0xff]  ;;  %v43_v56 = vld [vmem:[%s3458_s1 + $0xe0] sm:$0xff] }
   0xe   :  { %v960_v51 = vld [vmem:[%s3458_s1 + $0x250] sm:$0xff]  ;;  %v955_v58 = vld [vmem:[%s3458_s1 + $0x228] sm:$0xff]  ;;  %v954_v59 = vld [vmem:[%s3458_s1 + $0x220] sm:$0xff] }
   0xf   :  { %v956_v57 = vld [vmem:[%s3458_s1 + $0x230] sm:$0xff]  ;;  %v2290_v60 = vld [vmem:[%s3458_s1 + $0xd8] ss:$0 sm:$0xff] }
  0x10   :  { %v2305_v0 = vld [vmem:[%s3458_s1 + $0x218] ss:$0 sm:$0xff]  ;;  %v445_v3 = vld [vmem:[%s3458_s1 + $0x110] sm:$0xf] }
  0x74   :  { %v132_v4 = vpop.permute.xlu0 %131 }
  0x75   :  { %2480 = vmatmul.mubr.msk.f32.vlgmr.msra.gmra.mxu1 %vm52_vm2, %v132_v4 }
  0x76   :  { %295 = vmatpush1.msra.mxu1 %v33_v6  ;;  %v444_v6 = vld [vmem:[%s3458_s1 + $0x108] sm:$0xff] }
  0x77   :  { %296 = vmatprep.subr.mxu1 %v2759_v1 }
  0x78   :  { %v207_v5 = vpop.permute.xlu0 %206  ;;  %297 = vmatpush1.msra.mxu1 %v32_v7 }
  0x79   :  { %2487 = vmatmul.mubr.msk.f32.vlgmr.msra.gmra.mxu0 %vm52_vm2, %v207_v5  ;;  %298 = vmatprep.subr.mxu1 %v2759_v1 }
  0x7a   :  { %2497 = vmatprep.mubr.msk.f32.mxu0 %vm3461_vm1, %v2759_v1  ;;  %299 = vmatpush1.msra.mxu1 %v31_v8 }
  0x7b   :  { %300 = vmatprep.subr.mxu1 %v2759_v1  ;;  %2490 = vmatpush3.msra.mxu0 %v46_v35  ;;  %v463_v35 = vld [vmem:[%s3458_s1 + $0x1a0] sm:$0xff] }
  0x7c   :  { %301 = vmatpush1.msra.mxu1 %v30_v9  ;;  %2491 = vmatprep.subr.mxu0 %v2759_v1 }
  0x7d   :  { %302 = vmatprep.subr.mxu1 %v2759_v1  ;;  %2492 = vmatpush3.msra.mxu0 %v45_v38 }
  0x7e   :  { %303 = vmatpush1.msra.mxu1 %v29_v10  ;;  %2493 = vmatprep.subr.mxu0 %v2759_v1  ;;  %v634_v10 = vpop.permute.xlu0 %633 }
  0x7f   :  { %304 = vmatprep.subr.mxu1 %v2759_v1  ;;  %2494 = vmatpush3.msra.mxu0 %v44_v54 }
  0x80   :  { %305 = vmatpush1.msra.mxu1 %v28_v11  ;;  %2495 = vmatprep.subr.mxu0 %v2759_v1  ;;  %v462_v11 = vld [vmem:[%s3458_s1 + $0x198] sm:$0xff] }
  0x81   :  { %306 = vmatprep.subr.mxu1 %v2759_v1  ;;  %2496 = vmatpush3.msra.mxu0 %v43_v56  ;;  %v473_v56 = vld [vmem:[%s3458_s1 + $0x1f0] sm:$0xff] }
  0x82   :  { %307 = vmatpush1.msra.mxu1 %v27_v12  ;;  %2500 = vmatprep.subr.mxu0 %v2759_v1  ;;  %v461_v12 = vld [vmem:[%s3458_s1 + $0x190] sm:$0xff] }
  0x83   :  { %308 = vmatprep.subr.mxu1 %v2759_v1 }
  0x84   :  { %309 = vmatpush1.msra.mxu1 %v26_v13  ;;  %v460_v13 = vld [vmem:[%s3458_s1 + $0x188] sm:$0xff] }
  0x85   :  { %310 = vmatprep.subr.mxu1 %v2759_v1 }
  0x86   :  { %311 = vmatpush1.msra.mxu1 %v25_v15  ;;  %v458_v15 = vld [vmem:[%s3458_s1 + $0x178] sm:$0xff] }
  0x87   :  { %312 = vmatprep.subr.mxu1 %v2759_v1 }
  0x88   :  { %313 = vmatpush1.msra.mxu1 %v24_v17  ;;  %v456_v17 = vld [vmem:[%s3458_s1 + $0x168] sm:$0xff] }
  0x89   :  { %314 = vmatprep.subr.mxu1 %v2759_v1 }
  0x8a   :  { %315 = vmatpush1.msra.mxu1 %v23_v18  ;;  %v455_v18 = vld [vmem:[%s3458_s1 + $0x160] sm:$0xff] }
  0x8b   :  { %316 = vmatprep.subr.mxu1 %v2759_v1 }
  0x8c   :  { %317 = vmatpush1.msra.mxu1 %v22_v19  ;;  %v454_v19 = vld [vmem:[%s3458_s1 + $0x158] sm:$0xff] }
  0x8d   :  { %318 = vmatprep.subr.mxu1 %v2759_v1 }
  0x8e   :  { %319 = vmatpush1.msra.mxu1 %v21_v20  ;;  %v453_v20 = vld [vmem:[%s3458_s1 + $0x150] sm:$0xff] }
  0x8f   :  { %320 = vmatprep.subr.mxu1 %v2759_v1 }
  0x90   :  { %321 = vmatpush1.msra.mxu1 %v20_v21  ;;  %v452_v21 = vld [vmem:[%s3458_s1 + $0x148] sm:$0xff] }
  0x91   :  { %322 = vmatprep.subr.mxu1 %v2759_v1 }
  0x92   :  { %323 = vmatpush1.msra.mxu1 %v19_v22  ;;  %v451_v22 = vld [vmem:[%s3458_s1 + $0x140] sm:$0xff] }
  0x93   :  { %324 = vmatprep.subr.mxu1 %v2759_v1 }
  0x94   :  { %325 = vmatpush1.msra.mxu1 %v18_v23  ;;  %v450_v23 = vld [vmem:[%s3458_s1 + $0x138] sm:$0xff] }
  0x95   :  { %342 = vmatprep.subr.mxu1 %v2759_v1 }
  0x96   :  { %343 = vmatpush2.msra.mxu1 %v41_v24  ;;  %v449_v24 = vld [vmem:[%s3458_s1 + $0x130] sm:$0xff] }
  0x97   :  { %344 = vmatprep.subr.mxu1 %v2759_v1 }
  0x98   :  { %345 = vmatpush2.msra.mxu1 %v40_v25  ;;  %v448_v25 = vld [vmem:[%s3458_s1 + $0x128] sm:$0xff] }
  0x99   :  { %346 = vmatprep.subr.mxu1 %v2759_v1 }
  0x9a   :  { %347 = vmatpush2.msra.mxu1 %v39_v26  ;;  %v447_v26 = vld [vmem:[%s3458_s1 + $0x120] sm:$0xff] }
  0x9b   :  { %348 = vmatprep.subr.mxu1 %v2759_v1 }
  0x9c   :  { %349 = vmatpush2.msra.mxu1 %v38_v27  ;;  %v470_v27 = vld [vmem:[%s3458_s1 + $0x1d8] sm:$0xff] }
  0x9d   :  { %350 = vmatprep.subr.mxu1 %v2759_v1 }
  0x9e   :  { %351 = vmatpush2.msra.mxu1 %v37_v28  ;;  %v469_v28 = vld [vmem:[%s3458_s1 + $0x1d0] sm:$0xff] }
  0x9f   :  { %352 = vmatprep.subr.mxu1 %v2759_v1 }
  0xa0   :  { %353 = vmatpush2.msra.mxu1 %v36_v29  ;;  %v468_v29 = vld [vmem:[%s3458_s1 + $0x1c8] sm:$0xff] }
  0xa1   :  { %354 = vmatprep.subr.mxu1 %v2759_v1 }
  0xa2   :  { %355 = vmatpush2.msra.mxu1 %v35_v30  ;;  %v467_v30 = vld [vmem:[%s3458_s1 + $0x1c0] sm:$0xff] }
  0xa3   :  { %356 = vmatprep.subr.mxu1 %v2759_v1 }
  0xa4   :  { %357 = vmatpush2.msra.mxu1 %v34_v31  ;;  %v466_v31 = vld [vmem:[%s3458_s1 + $0x1b8] sm:$0xff] }
  0xa5   :  { %2532 = vmatprep.subr.mxu1 %v2759_v1 }
  0xc7   :  { %v2847_v14 = vpop.f32.mrf.mxu0 }
  0xc8   :  { %v127_v44 = vadd.f32 %v2283_v33, %v2847_v14  ;;  %v459_v14 = vld [vmem:[%s3458_s1 + $0x180] sm:$0xff] }
  0xc9   :  { %v2474_v16 = vpop.f32.mrf.mxu0 }
  0xca   :  { %v130_v45 = vmax.f32 %v127_v44, 0.0  ;;  %v457_v16 = vld [vmem:[%s3458_s1 + $0x170] sm:$0xff] }
 0x135   :  { %v201_v34 = vpop.f32.mrf.mxu1 }
 0x136   :  { %v202_v36 = vadd.f32 %v2283_v33, %v201_v34 }
 0x137   :  { %v2481_v37 = vpop.f32.mrf.mxu1 }
 0x138   :  { %v205_v39 = vmax.f32 %v202_v36, 0.0  ;;  %v2294_v37 = vld [vmem:[%s3458_s1 + $0x118] ss:$0 sm:$0xff] }
 0x139   :  { %v276_v40 = vpop.f32.mrf.mxu0 }
 0x13a   :  { %282 = vrot.lane.b32.xlu1 %v205_v39, %s2763_s16  ;;  %v277_v41 = vadd.f32 %v2283_v33, %v276_v40  ;;  %v464_v33 = vld [vmem:[%s3458_s1 + $0x1a8] sm:$0xff] }
 0x13b   :  { %v2488_v42 = vpop.f32.mrf.mxu0 }
 0x13c   :  { %v280_v43 = vmax.f32 %v277_v41, 0.0 }
 0x13e   :  { %2291 = vmatprep.mubr.msk.f32.mxu1 %vm3460_vm3, %v280_v43  ;;  %558 = vrot.lane.b32.xlu1 %v2918_v32, %s2761_s15 }
 0x1ac   :  { %v283_v46 = vpop.permute.xlu1 %282 }
 0x1ad   :  { %v286_v48 = vsel %vm3460_vm3, %v130_v45, %v283_v46 }
 0x1ae   :  { %359 = vmatmul.mubr.f32.vlgmr.msra.gmra.mxu1 %v286_v48 }
 0x1af   :  { %2533 = vmatpush3.msk.msra.mxu1 %vm3463_vm4, %v869_v47  ;;  %2534 = vmatprep.mubr.msk.f32.mxu1 %vm3461_vm1, %v2759_v1 }
 0x1b0   :  { %2537 = vmatprep.subr.mxu1 %v2759_v1  ;;  %v559_v9 = vpop.permute.xlu1 %558 }
 0x1b2   :  { %2535 = vmatmul.mubr.msk.f32.vlgmr.msra.gmra.mxu1 %vm875_vm5, %v13_v49 }
 0x1b3   :  { %2538 = vmatpush3.msra.mxu1 %v961_v50  ;;  %2553 = vmatprep.mubr.msk.f32.mxu1 %vm3461_vm1, %v2759_v1 }
 0x1b4   :  { %2539 = vmatprep.subr.mxu1 %v2759_v1 }
 0x1b5   :  { %2540 = vmatpush3.msra.mxu1 %v960_v51 }
 0x1b6   :  { %2541 = vmatprep.subr.mxu1 %v2759_v1 }
 0x1b7   :  { %2542 = vmatpush3.msra.mxu1 %v959_v52 }
 0x1b8   :  { %2543 = vmatprep.subr.mxu1 %v2759_v1 }
 0x1b9   :  { %2544 = vmatpush3.msra.mxu1 %v958_v53  ;;  %v475_v53 = vld [vmem:[%s3458_s1 + $0x200] sm:$0xff] }
 0x1ba   :  { %2545 = vmatprep.subr.mxu1 %v2759_v1 }
 0x1bb   :  { %2546 = vmatpush3.msra.mxu1 %v957_v55  ;;  %v474_v55 = vld [vmem:[%s3458_s1 + $0x1f8] sm:$0xff] }
 0x1bc   :  { %2547 = vmatprep.subr.mxu1 %v2759_v1 }
 0x1bd   :  { %2548 = vmatpush3.msra.mxu1 %v956_v57  ;;  %v472_v57 = vld [vmem:[%s3458_s1 + $0x1e8] sm:$0xff] }
 0x1be   :  { %2549 = vmatprep.subr.mxu1 %v2759_v1 }
 0x1bf   :  { %2550 = vmatpush3.msra.mxu1 %v955_v58  ;;  %v1085_v58 = vld [vmem:[%s3458_s1 + $0x280] sm:$0xff] }
 0x1c0   :  { %2551 = vmatprep.subr.mxu1 %v2759_v1 }
 0x1c1   :  { %2552 = vmatpush3.msra.mxu1 %v954_v59  ;;  %v2301_v59 = vld [vmem:[%s3458_s1 + $0x1e0] ss:$0 sm:$0xff] }
 0x26e   :  { %v360_v61 = vpop.f32.mrf.mxu1 }
 0x26f   :  { %v361_v62 = vadd.f32 %v2290_v60, %v360_v61 }
 0x270   :  { %v362_v63 = vpop.f32.mrf.mxu1 }
 0x271   :  { %v364_v2 = vmax.f32 %v361_v62, 0.0 }
 0x272   :  { %v949_v4 = vpop.f32.mrf.mxu1 }
 0x273   :  { %v950_v5 = vadd.f32 %v2305_v0, %v949_v4  ;;  %2498 = vmatmul.mubr.msk.f32.vlgmr.msra.gmra.mxu0 %vm369_vm6, %v364_v2  ;;  %v1084_v0 = vld [vmem:[%s3458_s1 + $0x278] sm:$0xff]  ;;  %v1083_v2 = vld [vmem:[%s3458_s1 + $0x270] sm:$0xff]  ;;  %v2308_v4 = vld [vmem:[%s3458_s1 + $0x260] ss:$0 sm:$0xff] }
 0x274   :  { %2501 = vmatpush3.msk.msra.mxu0 %vm56_vm0, %v445_v3  ;;  %2504 = vmatprep.mubr.msk.f32.mxu0 %vm3461_vm1, %v2759_v1  ;;  %v2536_v7 = vpop.f32.mrf.mxu1 }
 0x275   :  { %v953_v8 = vmax.f32 %v950_v5, 0.0  ;;  %2502 = vmatprep.subr.mxu0 %v2759_v1 }
 0x276   :  { %2503 = vmatpush3.msra.mxu0 %v444_v6 }
 0x277   :  { %2507 = vmatprep.subr.mxu0 %v2759_v1  ;;  %2505 = vmatmul.mubr.msk.f32.vlgmr.msra.gmra.mxu0 %vm52_vm2, %v2918_v32  ;;  %v465_v32 = vld [vmem:[%s3458_s1 + $0x1b0] sm:$0xff] }
 0x278   :  { %2508 = vmatpush3.msk.msra.mxu0 %vm56_vm0, %v445_v3  ;;  %2554 = vmatmul.mubr.msk.f32.vlgmr.msra.gmra.mxu1 %vm3460_vm3, %v953_v8  ;;  %v2303_v8 = vld [vmem:[%s3458_s1 + $0x208] ss:$0 sm:$0xff] }
 0x279   :  { %2509 = vmatprep.subr.mxu0 %v2759_v1  ;;  %2511 = vmatprep.mubr.msk.f32.mxu0 %vm3461_vm1, %v2759_v1 }
 0x27a   :  { %2510 = vmatpush3.msra.mxu0 %v444_v6 }
 0x27b   :  { %2512 = vmatmul.mubr.msk.f32.vlgmr.msra.gmra.mxu0 %vm52_vm2, %v559_v9  ;;  %2514 = vmatprep.subr.mxu0 %v2759_v1 }
 0x27c   :  { %2515 = vmatpush3.msk.msra.mxu0 %vm56_vm0, %v445_v3  ;;  %2518 = vmatprep.mubr.msk.f32.mxu0 %vm3461_vm1, %v2759_v1  ;;  %v1082_v3 = vld [vmem:[%s3458_s1 + $0x268] sm:$0xff] }
 0x27d   :  { %2516 = vmatprep.subr.mxu0 %v2759_v1 }
 0x27e   :  { %2517 = vmatpush3.msra.mxu0 %v444_v6  ;;  %v2292_v6 = vld [vmem:[%s3458_s1 + $0x100] ss:$0 sm:$0xff] }
 0x27f   :  { %2519 = vmatmul.mubr.msk.f32.vlgmr.msra.gmra.mxu0 %vm52_vm2, %v634_v10  ;;  %720 = vmatprep.subr.mxu0 %v2759_v1 }
 0x280   :  { %721 = vmatpush1.msra.mxu0 %v462_v11 }
 0x281   :  { %722 = vmatprep.subr.mxu0 %v2759_v1 }
 0x282   :  { %723 = vmatpush1.msra.mxu0 %v461_v12 }
 0x283   :  { %724 = vmatprep.subr.mxu0 %v2759_v1 }
 0x284   :  { %725 = vmatpush1.msra.mxu0 %v460_v13 }
 0x285   :  { %726 = vmatprep.subr.mxu0 %v2759_v1 }
 0x286   :  { %727 = vmatpush1.msra.mxu0 %v459_v14 }
 0x287   :  { %728 = vmatprep.subr.mxu0 %v2759_v1 }
 0x288   :  { %729 = vmatpush1.msra.mxu0 %v458_v15 }
 0x289   :  { %730 = vmatprep.subr.mxu0 %v2759_v1 }
 0x28a   :  { %731 = vmatpush1.msra.mxu0 %v457_v16 }
 0x28b   :  { %732 = vmatprep.subr.mxu0 %v2759_v1 }
 0x28c   :  { %733 = vmatpush1.msra.mxu0 %v456_v17 }
 0x28d   :  { %734 = vmatprep.subr.mxu0 %v2759_v1 }
 0x28e   :  { %735 = vmatpush1.msra.mxu0 %v455_v18 }
 0x28f   :  { %736 = vmatprep.subr.mxu0 %v2759_v1 }
 0x290   :  { %737 = vmatpush1.msra.mxu0 %v454_v19 }
 0x291   :  { %738 = vmatprep.subr.mxu0 %v2759_v1 }
 0x292   :  { %739 = vmatpush1.msra.mxu0 %v453_v20 }
 0x293   :  { %740 = vmatprep.subr.mxu0 %v2759_v1 }
 0x294   :  { %741 = vmatpush1.msra.mxu0 %v452_v21  ;;  %v1049_v21 = vlaneseq }
 0x295   :  { %742 = vmatprep.subr.mxu0 %v2759_v1 }
 0x296   :  { %743 = vmatpush1.msra.mxu0 %v451_v22  ;;  %v3187_v22 = vand.u32 127, %v1049_v21 }
 0x297   :  { %744 = vmatprep.subr.mxu0 %v2759_v1 }
 0x298   :  { %745 = vmatpush1.msra.mxu0 %v450_v23  ;;  %v1050_v23 = vshrl.u32 %v1049_v21, 7  ;;  %vm1070_vm7 = vcmp.eq.s32.totalorder %v3187_v22, 1  ;;  %vm1071_vm8 = vcmp.eq.s32.totalorder %v3187_v22, 3  ;;  %vm1073_vm9 = vcmp.ge.s32.totalorder %v3187_v22, 7 }
 0x299   :  { %746 = vmatprep.subr.mxu0 %v2759_v1  ;;  %vm1074_vm10 = vcmp.lt.s32.totalorder %v3187_v22, 10  ;;  %vm1072_vm11 = vmor %vm1070_vm7, %vm1071_vm8  ;;  %vm1251_vm7 = vcmask 74752   ;;  %vm1247_vm8 = vcmask 80896  }
 0x29a   :  { %747 = vmatpush1.msra.mxu0 %v449_v24  ;;  %v1051_v24 = vadd.s32 8, %v1050_v23  ;;  %vm1054_vm12 = vcmp.eq.s32.totalorder %v1050_v23, 1  ;;  %vm1056_vm13 = vcmp.eq.s32.totalorder %v1050_v23, 3  ;;  %vm1075_vm14 = vmand %vm1073_vm9, %vm1074_vm10  ;;  %vm3467_vm9 = vcmask 523264  }
 0x29b   :  { %748 = vmatprep.subr.mxu0 %v2759_v1  ;;  %vm1058_vm15 = vmor %vm1054_vm12, %vm1056_vm13  ;;  %vm1989_vm12 = vcmask 9216   ;;  %vm2271_vm13 = vcmask 7168  }
 0x29c   :  { %749 = vmatpush1.msra.mxu0 %v448_v25  ;;  %vm1063_vm2 = vcmp.lt.s32.totalorder %v1051_v24, 10  ;;  %vm1076_vm5 = vmor %vm1072_vm11, %vm1075_vm14  ;;  %v2764_v25 = vmov 0   ;;  %vm1962_vm11 = vcmp.eq.s32.totalorder %v3187_v22, 0  ;;  %vm2273_vm14 = vcmask 23552  }
 0x29d   :  { %750 = vmatprep.subr.mxu0 %v2759_v1 }
 0x29e   :  { %751 = vmatpush1.msra.mxu0 %v447_v26  ;;  %v1069_v26 = vsel %vm1063_vm2, 1, %v2764_v25 }
 0x29f   :  { %768 = vmatprep.subr.mxu0 %v2759_v1 }
 0x2a0   :  { %769 = vmatpush2.msra.mxu0 %v470_v27  ;;  %v1077_v27 = vsel %vm1076_vm5, 1, %v2764_v25 }
 0x2a1   :  { %770 = vmatprep.subr.mxu0 %v2759_v1 }
 0x2a2   :  { %771 = vmatpush2.msra.mxu0 %v469_v28 }
 0x2a3   :  { %772 = vmatprep.subr.mxu0 %v2759_v1 }
 0x2a4   :  { %773 = vmatpush2.msra.mxu0 %v468_v29  ;;  %v2765_v29 = vmov -1e+30  }
 0x2a5   :  { %774 = vmatprep.subr.mxu0 %v2759_v1 }
 0x2a6   :  { %775 = vmatpush2.msra.mxu0 %v467_v30 }
 0x2a7   :  { %776 = vmatprep.subr.mxu0 %v2759_v1 }
 0x2a8   :  { %777 = vmatpush2.msra.mxu0 %v466_v31 }
 0x2a9   :  { %778 = vmatprep.subr.mxu0 %v2759_v1 }
 0x2aa   :  { %779 = vmatpush2.msra.mxu0 %v465_v32 }
 0x2ab   :  { %780 = vmatprep.subr.mxu0 %v2759_v1 }
 0x2ac   :  { %781 = vmatpush2.msra.mxu0 %v464_v33 }
 0x2ad   :  { %782 = vmatprep.subr.mxu0 %v2759_v1 }
 0x2ae   :  { %783 = vmatpush2.msra.mxu0 %v463_v35 }
 0x2af   :  { %2521 = vmatprep.subr.mxu0 %v2759_v1 }
 0x333   :  { %v439_v34 = vpop.f32.mrf.mxu0 }
 0x334   :  { %v440_v9 = vadd.f32 %v2292_v6, %v439_v34 }
 0x335   :  { %v2499_v36 = vpop.f32.mrf.mxu0 }
 0x336   :  { %v3172_v15 = vmax.f32 %v440_v9, 0.0 }
 0x337   :  { %v553_v38 = vpop.f32.mrf.mxu0 }
 0x338   :  { %v554_v39 = vadd.f32 %v2294_v37, %v553_v38  ;;  %v1036_v40 = vpop.f32.mrf.mxu1 }
 0x339   :  { %v2506_v41 = vpop.f32.mrf.mxu0  ;;  %v3161_v5 = vadd.f32 %v2308_v4, %v1036_v40 }
 0x33a   :  { %v2555_v42 = vpop.f32.mrf.mxu1  ;;  %v557_v51 = vmax.f32 %v554_v39, 0.0 }
 0x33b   :  { %v628_v43 = vpop.f32.mrf.mxu0  ;;  %v1040_v7 = vmax.f32 %v3161_v5, 0.0  ;;  %v1710_v5 = vld [vmem:[%s3458_s1 + $0x2b8] sm:$0xff] }
 0x33c   :  { %v629_v44 = vadd.f32 %v2294_v37, %v628_v43 }
 0x33d   :  { %v2513_v45 = vpop.f32.mrf.mxu0  ;;  %v1042_v12 = vrot.slane %v1040_v7, 6 }
 0x33e   :  { %v632_v46 = vmax.f32 %v629_v44, 0.0 }
 0x33f   :  { %v703_v47 = vpop.f32.mrf.mxu0  ;;  %v1047_v17 = vsel %vm3463_vm4, %v3172_v15, %v1042_v12 }
 0x340   :  { %709 = vrot.lane.b32.xlu1 %v632_v46, %s2763_s16  ;;  %v704_v48 = vadd.f32 %v2294_v37, %v703_v47 }
 0x341   :  { %v2520_v49 = vpop.f32.mrf.mxu0 }
 0x342   :  { %v707_v50 = vmax.f32 %v704_v48, 0.0  ;;  %v1357_v48 = vld [vmem:[%s3458_s1 + $0x2a0] sm:$0xff] }
 0x344   :  { %2302 = vmatprep.mubr.msk.f32.mxu0 %vm3460_vm3, %v707_v50 }
 0x3b2   :  { %v710_v52 = vpop.permute.xlu1 %709 }
 0x3b3   :  { %v712_v54 = vsel %vm3460_vm3, %v557_v51, %v710_v52 }
 0x3b4   :  { %785 = vmatmul.mubr.f32.vlgmr.msra.gmra.mxu0 %v712_v54 }
 0x3b5   :  { %2522 = vmatpush3.msra.mxu0 %v475_v53  ;;  %2529 = vmatprep.mubr.msk.f32.mxu0 %vm3461_vm1, %v2759_v1  ;;  %vm1079_vm1 = vcmp.eq.s32.totalorder %v1069_v26, %v1077_v27 }
 0x3b6   :  { %2523 = vmatprep.subr.mxu0 %v2759_v1  ;;  %v3193_v30 = vsel %vm1079_vm1, 0.0, %v2765_v29  ;;  %vm3464_vm1 = vcmask 1041408  }
 0x3b7   :  { %2524 = vmatpush3.msra.mxu0 %v474_v55  ;;  %v1356_v55 = vld [vmem:[%s3458_s1 + $0x298] sm:$0xff] }
 0x3b8   :  { %2525 = vmatprep.subr.mxu0 %v2759_v1 }
 0x3b9   :  { %2526 = vmatpush3.msra.mxu0 %v473_v56  ;;  %v1355_v56 = vld [vmem:[%s3458_s1 + $0x290] sm:$0xff] }
 0x3ba   :  { %2527 = vmatprep.subr.mxu0 %v2759_v1 }
 0x3bb   :  { %2528 = vmatpush3.msra.mxu0 %v472_v57  ;;  %v1354_v57 = vld [vmem:[%s3458_s1 + $0x288] sm:$0xff] }
 0x3bc   :  { %2556 = vmatprep.subr.mxu0 %v1085_v58 }
 0x474   :  { %v786_v60 = vpop.f32.mrf.mxu0 }
 0x475   :  { %v787_v61 = vadd.f32 %v2301_v59, %v786_v60 }
 0x476   :  { %v788_v62 = vpop.f32.mrf.mxu0 }
 0x477   :  { %v790_v63 = vmax.f32 %v787_v61, 0.0 }
 0x479   :  { %2530 = vmatmul.mubr.msk.f32.vlgmr.msra.gmra.mxu0 %vm369_vm6, %v790_v63 }
 0x47a   :  { %2557 = vmatpush3.msra.mxu0 %v1085_v58 }
 0x47b   :  { %2558 = vmatprep.subr.mxu0 %v1084_v0 }
 0x47c   :  { %2559 = vmatpush3.msra.mxu0 %v1084_v0 }
 0x47d   :  { %2560 = vmatprep.subr.mxu0 %v1083_v2 }
 0x47e   :  { %2561 = vmatpush3.msra.mxu0 %v1083_v2 }
 0x47f   :  { %2562 = vmatprep.subr.mxu0 %v1082_v3 }
 0x480   :  { %2563 = vmatpush3.msra.mxu0 %v1082_v3 }
 0x539   :  { %v864_v10 = vpop.f32.mrf.mxu0 }
 0x53a   :  { %v865_v11 = vadd.f32 %v2303_v8, %v864_v10 }
 0x53b   :  { %v2531_v13 = vpop.f32.mrf.mxu0 }
 0x53c   :  { %v868_v14 = vmax.f32 %v865_v11, 0.0 }
 0x53e   :  { %v1045_v16 = vrot.slane %v868_v14, 4 }
 0x540   :  { %2567 = vmatprep.subr.msk.mxu1 %vm369_vm6, %v1045_v16  ;;  %2574 = vmatprep.subr.msk.mxu0 %vm3463_vm4, %v1045_v16  ;;  %v1048_v18 = vsel %vm56_vm0, %v1047_v17, %v1045_v16  ;;  %vm1060_vm0 = vcmp.ge.s32.totalorder %v1050_v23, 7  ;;  %v1711_v23 = vld [vmem:[%s3458_s1 + $0x2c0] sm:$0xff] }
 0x541   :  { %2564 = vmatprep.mubr.msk.f32.mxu0 %vm369_vm6, %v1048_v18  ;;  %2568 = vmatpush3.xpose.msk.msra.mxu1 %vm369_vm6, %v1045_v16  ;;  %vm1066_vm3 = vmor %vm1058_vm15, %vm1060_vm0  ;;  %vm2275_vm15 = vcmask 31744   ;;  %vm2277_vm0 = vcmask 41984  }
 0x542   :  { %2565 = vmatmul.mubr.msk.f32.vlgmr.msra.gmra.mxu0 %vm369_vm6, %v1045_v16  ;;  %2569 = vmatprep.subr.msk.mxu1 %vm369_vm6, %v1048_v18  ;;  %v1068_v28 = vsel %vm1066_vm3, 1, %v2764_v25  ;;  %vm3465_vm3 = vmmov %vm3464_vm1 }
 0x543   :  { %2575 = vmatpush3.msk.msra.mxu0 %vm3463_vm4, %v1045_v16  ;;  %vm1078_vm4 = vcmp.eq.s32.totalorder %v1068_v28, %v1077_v27 }
 0x544   :  { %2576 = vmatprep.subr.mxu0 %v1048_v18  ;;  %v3195_v32 = vsel %vm1078_vm4, 0.0, %v2765_v29  ;;  %vm3466_vm4 = vmmov 0  }
 0x545   :  { %2577 = vmatpush3.msra.mxu0 %v1048_v18  ;;  %2570 = vmatpush3.xpose.msk.msra.mxu1 %vm369_vm6, %v1048_v18 }
 0x546   :  { %2592 = vmatprep.subr.mxu1 %v1085_v58  ;;  %2581 = vmatprep.subr.mxu0 %v1357_v48 }
 0x602   :  { %v2566_v19 = vpop.f32.mrf.mxu0 }
 0x604   :  { %v1157_v20 = vpop.f32.mrf.mxu0 }
 0x605   :  { %2571 = vmatprep.mubr.msk.f32.mxu1 %vm369_vm6, %v1157_v20 }
 0x606   :  { %2572 = vmatmul.mubr.msk.f32.vlgmr.msra.gmra.mxu1 %vm369_vm6, %v2566_v19 }
 0x607   :  { %2593 = vmatpush3.msra.mxu1 %v1085_v58 }
 0x608   :  { %2594 = vmatprep.subr.mxu1 %v1084_v0 }
 0x609   :  { %2595 = vmatpush3.msra.mxu1 %v1084_v0 }
 0x60a   :  { %2596 = vmatprep.subr.mxu1 %v1083_v2 }
 0x60b   :  { %2597 = vmatpush3.msra.mxu1 %v1083_v2 }
 0x60c   :  { %2598 = vmatprep.subr.mxu1 %v1082_v3 }
 0x60d   :  { %2599 = vmatpush3.msra.mxu1 %v1082_v3 }
 0x6c6   :  { %v2573_v31 = vpop.f32.mrf.mxu1 }
 0x6c7   :  { %v1244_v33 = vadd.f32 %v2573_v31, %v3193_v30  ;;  %v1796_v31 = vld [vmem:[%s3458_s1 + $0x2e0] sm:$0xff] }
 0x6c8   :  { %v1238_v34 = vpop.f32.mrf.mxu1 }
 0x6c9   :  { %v1239_v35 = vadd.f32 %v1238_v34, %v3195_v32  ;;  %v1252_v36 = vsel %vm1251_vm7, %v1244_v33, -inf }
 0x6ca   :  { %1253 = vmax.xlane.f32.xlu1 %v1252_v36  ;;  %v1793_v36 = vld [vmem:[%s3458_s1 + $0x2c8] sm:$0xff] }
 0x6cb   :  { %v1248_v37 = vsel %vm1247_vm8, %v1239_v35, -inf }
 0x6cc   :  { %1249 = vmax.xlane.f32.xlu0 %v1248_v37  ;;  %v1883_v37 = vld [vmem:[%s3458_s1 + $0x328] sm:$0xff] }
 0x753   :  { %v1254_v38 = vpop.xlane.xlu1 %1253 }
 0x754   :  { %v1256_v39 = vsub.f32 %v1244_v33, %v1254_v38  ;;  %v1882_v38 = vld [vmem:[%s3458_s1 + $0x320] sm:$0xff] }
 0x755   :  { %v1250_v40 = vpop.xlane.xlu0 %1249 }
 0x756   :  { %v1255_v41 = vsub.f32 %v1239_v35, %v1250_v40  ;;  %v1259_v42 = vmul.f32 1.442695, %v1256_v39  ;;  %v1794_v35 = vld [vmem:[%s3458_s1 + $0x2d0] sm:$0xff]  ;;  %v1881_v39 = vld [vmem:[%s3458_s1 + $0x318] sm:$0xff] }
 0x757   :  { %v1880_v40 = vld [vmem:[%s3458_s1 + $0x310] sm:$0xff] }
 0x758   :  { %v1257_v43 = vmul.f32 1.442695, %v1255_v41  ;;  %v1879_v41 = vld [vmem:[%s3458_s1 + $0x308] sm:$0xff] }
 0x75a   :  { %2733 = vpow2.f32 %v1257_v43 }
 0x75b   :  { %2735 = vpow2.f32 %v1259_v42 }
 0x767   :  { %v2734_v44 = vpop.eup %2733 }
 0x768   :  { %v1261_v45 = vsel %vm1247_vm8, %v2734_v44, 0.0  ;;  %v2736_v46 = vpop.eup %2735 }
 0x769   :  { %1262 = vadd.xlane.f32.xlu0 %v1261_v45  ;;  %v1264_v47 = vsel %vm1251_vm7, %v2736_v46, 0.0  ;;  %v1996_v45 = vld [vmem:[%s3458_s1 + $0x350] sm:$0xff] }
 0x76d   :  { %1265 = vadd.xlane.f32.xlu0 %v1264_v47  ;;  %v1994_v47 = vld [vmem:[%s3458_s1 + $0x340] sm:$0xff] }
 0x7f2   :  { %v1263_v49 = vpop.xlane.xlu0 %1262 }
 0x7f3   :  { %2737 = vrcp.f32 %v1263_v49  ;;  %v2087_v49 = vld [vmem:[%s3458_s1 + $0x398] sm:$0xff] }
 0x7f6   :  { %v1266_v50 = vpop.xlane.xlu0 %1265 }
 0x7f7   :  { %2739 = vrcp.f32 %v1266_v50  ;;  %v2086_v50 = vld [vmem:[%s3458_s1 + $0x390] sm:$0xff] }
 0x800   :  { %v2738_v51 = vpop.eup %2737 }
 0x801   :  { %v1269_v52 = vmul.f32 %v2738_v51, %v2734_v44  ;;  %v2085_v51 = vld [vmem:[%s3458_s1 + $0x388] sm:$0xff] }
 0x803   :  { %2578 = vmatprep.mubr.msk.f32.mxu0 %vm1247_vm8, %v1269_v52  ;;  %v2084_v52 = vld [vmem:[%s3458_s1 + $0x380] sm:$0xff] }
 0x804   :  { %v2740_v53 = vpop.eup %2739 }
 0x805   :  { %v1270_v54 = vmul.f32 %v2740_v53, %v2736_v46  ;;  %v1995_v46 = vld [vmem:[%s3458_s1 + $0x348] sm:$0xff]  ;;  %v2083_v53 = vld [vmem:[%s3458_s1 + $0x378] sm:$0xff] }
 0x807   :  { %2579 = vmatmul.mubr.msk.f32.vlgmr.msra.gmra.mxu0 %vm1247_vm8, %v1270_v54  ;;  %v2082_v54 = vld [vmem:[%s3458_s1 + $0x370] sm:$0xff] }
 0x808   :  { %2582 = vmatpush3.msra.mxu0 %v1357_v48  ;;  %v1993_v48 = vld [vmem:[%s3458_s1 + $0x338] sm:$0xff] }
 0x809   :  { %2583 = vmatprep.subr.mxu0 %v1356_v55 }
 0x80a   :  { %2584 = vmatpush3.msra.mxu0 %v1356_v55  ;;  %v2081_v55 = vld [vmem:[%s3458_s1 + $0x368] sm:$0xff] }
 0x80b   :  { %2585 = vmatprep.subr.mxu0 %v1355_v56 }
 0x80c   :  { %2586 = vmatpush3.msra.mxu0 %v1355_v56 }
 0x80d   :  { %2587 = vmatprep.subr.mxu0 %v1354_v57 }
 0x80e   :  { %2588 = vmatpush3.msra.mxu0 %v1354_v57  ;;  %v2080_v57 = vld [vmem:[%s3458_s1 + $0x360] sm:$0xff] }
 0x8c7   :  { %v2580_v58 = vpop.f32.mrf.mxu0 }
 0x8c9   :  { %v1345_v59 = vpop.f32.mrf.mxu0 }
 0x8ca   :  { %2589 = vmatprep.mubr.msk.f32.mxu0 %vm369_vm6, %v1345_v59  ;;  %v1878_v59 = vld [vmem:[%s3458_s1 + $0x300] sm:$0xff] }
 0x8cb   :  { %2590 = vmatmul.mubr.msk.f32.vlgmr.msra.gmra.mxu0 %vm369_vm6, %v2580_v58 }
 0x98b   :  { %v2591_v60 = vpop.f32.mrf.mxu0 }
 0x98c   :  { %v1440_v61 = vmax.f32 %v2591_v60, 0.0  ;;  %v1877_v60 = vld [vmem:[%s3458_s1 + $0x2f8] sm:$0xff] }
 0x98d   :  { %v1430_v62 = vpop.f32.mrf.mxu0 }
 0x98e   :  { %v1439_v63 = vmax.f32 %v1430_v62, 0.0  ;;  %2603 = vmatprep.subr.msk.mxu0 %vm369_vm6, %v1440_v61  ;;  %2610 = vmatprep.subr.msk.mxu1 %vm3464_vm1, %v1440_v61 }
 0x98f   :  { %2604 = vmatpush3.xpose.msk.msra.mxu0 %vm369_vm6, %v1440_v61 }
 0x990   :  { %2600 = vmatprep.mubr.msk.f32.mxu1 %vm369_vm6, %v1439_v63  ;;  %2605 = vmatprep.subr.msk.mxu0 %vm369_vm6, %v1439_v63 }
 0x991   :  { %2601 = vmatmul.mubr.msk.f32.vlgmr.msra.gmra.mxu1 %vm369_vm6, %v1440_v61 }
 0x992   :  { %2611 = vmatpush3.msk.msra.mxu1 %vm3465_vm3, %v1440_v61  ;;  %v1876_v61 = vld [vmem:[%s3458_s1 + $0x2f0] sm:$0xff] }
 0x993   :  { %2612 = vmatprep.subr.mxu1 %v1439_v63  ;;  %2606 = vmatpush3.xpose.msk.msra.mxu0 %vm369_vm6, %v1439_v63 }
 0x994   :  { %2613 = vmatpush3.msra.mxu1 %v1439_v63  ;;  %2628 = vmatprep.subr.mxu0 %v2759_v1 }
 0x995   :  { %2617 = vmatprep.subr.mxu1 %v1711_v23 }
 0xa51   :  { %v2602_v0 = vpop.f32.mrf.mxu1 }
 0xa53   :  { %v1513_v2 = vpop.f32.mrf.mxu1 }
 0xa54   :  { %2607 = vmatprep.mubr.msk.f32.mxu0 %vm369_vm6, %v1513_v2 }
 0xa55   :  { %2608 = vmatmul.mubr.msk.f32.vlgmr.msra.gmra.mxu0 %vm369_vm6, %v2602_v0 }
 0xa56   :  { %2636 = vmatprep.mubr.msk.f32.mxu0 %vm3466_vm4, %v2759_v1  ;;  %2629 = vmatpush3.msra.mxu0 %v1796_v31 }
 0xa57   :  { %2630 = vmatprep.subr.mxu0 %v2759_v1 }
 0xb15   :  { %v2609_v3 = vpop.f32.mrf.mxu0 }
 0xb16   :  { %v1600_v4 = vadd.f32 %v2609_v3, %v3193_v30  ;;  %v1708_v30 = vld [vmem:[%s3458_s1 + $0x2a8] sm:$0xff]  ;;  %v2187_v3 = vld [vmem:[%s3458_s1 + $0x420] sm:$0xff] }
 0xb17   :  { %v1594_v6 = vpop.f32.mrf.mxu0 }
 0xb18   :  { %v1595_v8 = vadd.f32 %v1594_v6, %v3195_v32  ;;  %v1606_v9 = vsel %vm1251_vm7, %v1600_v4, -inf  ;;  %v1795_v32 = vld [vmem:[%s3458_s1 + $0x2d8] sm:$0xff]  ;;  %v2185_v6 = vld [vmem:[%s3458_s1 + $0x410] sm:$0xff] }
 0xb19   :  { %1607 = vmax.xlane.f32.xlu0 %v1606_v9  ;;  %2631 = vmatpush3.msra.mxu0 %v1795_v32  ;;  %v2184_v9 = vld [vmem:[%s3458_s1 + $0x408] sm:$0xff] }
 0xb1a   :  { %v1603_v10 = vsel %vm1247_vm8, %v1595_v8, -inf  ;;  %2632 = vmatprep.subr.mxu0 %v2759_v1 }
 0xb1b   :  { %1604 = vmax.xlane.f32.xlu1 %v1603_v10  ;;  %2633 = vmatpush3.msra.mxu0 %v1794_v35 }
 0xb1c   :  { %2634 = vmatprep.subr.mxu0 %v2759_v1 }
 0xb1d   :  { %2635 = vmatpush3.msra.mxu0 %v1793_v36 }
 0xb1e   :  { %2658 = vmatprep.subr.mxu0 %v2759_v1 }
 0xba2   :  { %v1608_v11 = vpop.xlane.xlu0 %1607 }
 0xba3   :  { %v1610_v12 = vsub.f32 %v1600_v4, %v1608_v11  ;;  %v2186_v4 = vld [vmem:[%s3458_s1 + $0x418] sm:$0xff]  ;;  %v2183_v11 = vld [vmem:[%s3458_s1 + $0x400] sm:$0xff] }
 0xba4   :  { %v1605_v13 = vpop.xlane.xlu1 %1604 }
 0xba5   :  { %v1613_v14 = vmul.f32 1.442695, %v1610_v12  ;;  %v1609_v16 = vsub.f32 %v1595_v8, %v1605_v13  ;;  %v2182_v12 = vld [vmem:[%s3458_s1 + $0x3f8] sm:$0xff]  ;;  %v2181_v13 = vld [vmem:[%s3458_s1 + $0x3f0] sm:$0xff] }
 0xba7   :  { %2741 = vpow2.f32 %v1613_v14  ;;  %v1611_v17 = vmul.f32 1.442695, %v1609_v16  ;;  %v2180_v14 = vld [vmem:[%s3458_s1 + $0x3e8] sm:$0xff]  ;;  %v2179_v16 = vld [vmem:[%s3458_s1 + $0x3e0] sm:$0xff] }
 0xba9   :  { %2743 = vpow2.f32 %v1611_v17  ;;  %v2178_v17 = vld [vmem:[%s3458_s1 + $0x3d8] sm:$0xff] }
 0xbb4   :  { %v2742_v18 = vpop.eup %2741 }
 0xbb5   :  { %v1618_v19 = vsel %vm1251_vm7, %v2742_v18, 0.0 }
 0xbb6   :  { %v2744_v20 = vpop.eup %2743  ;;  %1619 = vadd.xlane.f32.xlu0 %v1618_v19  ;;  %v2177_v19 = vld [vmem:[%s3458_s1 + $0x3d0] sm:$0xff] }
 0xbb7   :  { %v1615_v21 = vsel %vm1247_vm8, %v2744_v20, 0.0 }
 0xbb8   :  { %1616 = vadd.xlane.f32.xlu1 %v1615_v21 }
 0xbc9   :  { %2076 = vrot.lane.b32.xlu1 %v1040_v7, %s2766_s26  ;;  %v1709_v7 = vld [vmem:[%s3458_s1 + $0x2b0] sm:$0xff] }
 0xc3f   :  { %v1620_v24 = vpop.xlane.xlu0 %1619 }
 0xc40   :  { %2745 = vrcp.f32 %v1620_v24 }
 0xc41   :  { %v1617_v25 = vpop.xlane.xlu1 %1616 }
 0xc42   :  { %2747 = vrcp.f32 %v1617_v25 }
 0xc45   :  { %v2077_v56 = vpop.permute.xlu1 %2076 }
 0xc46   :  { %v2079_v58 = vsel %vm369_vm6, %v3172_v15, %v2077_v56 }
 0xc4d   :  { %v2746_v26 = vpop.eup %2745 }
 0xc4e   :  { %v1624_v29 = vmul.f32 %v2746_v26, %v2742_v18  ;;  %v2341_v18 = vld [vmem:[%s3458_s1 + $0x3a0] ss:$0 sm:$0xff] }
 0xc4f   :  { %v2748_v27 = vpop.eup %2747  ;;  %v2175_v26 = vld [vmem:[%s3458_s1 + $0x3c0] sm:$0xff] }
 0xc50   :  { %v1623_v28 = vmul.f32 %v2748_v27, %v2744_v20  ;;  %v2174_v27 = vld [vmem:[%s3458_s1 + $0x3b8] sm:$0xff] }
 0xc52   :  { %2614 = vmatprep.mubr.msk.f32.mxu1 %vm1247_vm8, %v1623_v28  ;;  %v2173_v28 = vld [vmem:[%s3458_s1 + $0x3b0] sm:$0xff] }
 0xc53   :  { %2615 = vmatmul.mubr.msk.f32.vlgmr.msra.gmra.mxu1 %vm1247_vm8, %v1624_v29  ;;  %v2172_v29 = vld [vmem:[%s3458_s1 + $0x3a8] sm:$0xff] }
 0xc54   :  { %2618 = vmatpush3.msra.mxu1 %v1711_v23  ;;  %v2176_v23 = vld [vmem:[%s3458_s1 + $0x3c8] sm:$0xff] }
 0xc55   :  { %2619 = vmatprep.subr.mxu1 %v1710_v5 }
 0xc56   :  { %2620 = vmatpush3.msra.mxu1 %v1710_v5  ;;  %v2339_v5 = vld [vmem:[%s3458_s1 + $0x358] ss:$0 sm:$0xff] }
 0xc57   :  { %2621 = vmatprep.subr.mxu1 %v1709_v7 }
 0xc58   :  { %2622 = vmatpush3.msra.mxu1 %v1709_v7 }
 0xc59   :  { %2623 = vmatprep.subr.mxu1 %v1708_v30 }
 0xc5a   :  { %2624 = vmatpush3.msra.mxu1 %v1708_v30 }
 0xc5b   :  { %2639 = vmatprep.subr.mxu1 %v2759_v1 }
 0xd13   :  { %v2616_v33 = vpop.f32.mrf.mxu1 }
 0xd15   :  { %v1699_v34 = vpop.f32.mrf.mxu1 }
 0xd16   :  { %2625 = vmatprep.mubr.msk.f32.mxu1 %vm369_vm6, %v1699_v34  ;;  %v2334_v34 = vld [vmem:[%s3458_s1 + $0x330] ss:$0 sm:$0xff] }
 0xd17   :  { %2626 = vmatmul.mubr.msk.f32.vlgmr.msra.gmra.mxu1 %vm369_vm6, %v2616_v33  ;;  %v2337_v33 = vld [vmem:[%s3458_s1 + $0x430] ss:$0 sm:$0xff] }
 0xd18   :  { %2655 = vmatprep.mubr.msk.f32.mxu1 %vm3466_vm4, %v2759_v1  ;;  %2640 = vmatpush3.msra.mxu1 %v1883_v37  ;;  %v1976_v35 = vmul.f32 1.442695, %v2337_v33 }
 0xd19   :  { %2641 = vmatprep.subr.mxu1 %v2759_v1 }
 0xd1a   :  { %2642 = vmatpush3.msra.mxu1 %v1882_v38  ;;  %2749 = vpow2.f32 %v1976_v35 }
 0xd1b   :  { %2643 = vmatprep.subr.mxu1 %v2759_v1 }
 0xd1c   :  { %2644 = vmatpush3.msra.mxu1 %v1881_v39 }
 0xd1d   :  { %2645 = vmatprep.subr.mxu1 %v2759_v1 }
 0xd1e   :  { %2646 = vmatpush3.msra.mxu1 %v1880_v40 }
 0xd1f   :  { %2647 = vmatprep.subr.mxu1 %v2759_v1 }
 0xd20   :  { %2648 = vmatpush3.msra.mxu1 %v1879_v41 }
 0xd21   :  { %2649 = vmatprep.subr.mxu1 %v2759_v1 }
 0xd22   :  { %2650 = vmatpush3.msra.mxu1 %v1878_v59  ;;  %v2343_v59 = vld [vmem:[%s3458_s1 + $0x428] ss:$0 sm:$0xff] }
 0xd23   :  { %2651 = vmatprep.subr.mxu1 %v2759_v1 }
 0xd24   :  { %2652 = vmatpush3.msra.mxu1 %v1877_v60 }
 0xd25   :  { %2653 = vmatprep.subr.mxu1 %v2759_v1 }
 0xd26   :  { %2654 = vmatpush3.msra.mxu1 %v1876_v61 }
 0xd27   :  { %2688 = vmatprep.subr.mxu1 %v2759_v1  ;;  %v2750_v39 = vpop.eup %2749 }
 0xdd7   :  { %v2627_v42 = vpop.f32.mrf.mxu1 }
 0xdd8   :  { %v1983_v42 = vmul.f32 2.0, %v2750_v39 }
 0xdd9   :  { %v1784_v43 = vpop.f32.mrf.mxu1 }
 0xdda   :  { %v1792_v44 = vmax.f32 %v1784_v43, 0.0  ;;  %v1984_v43 = vmul.f32 %v2750_v39, %v1983_v42 }
 0xddc   :  { %2637 = vmatmul.mubr.msk.f32.vlgmr.msra.gmra.mxu0 %vm369_vm6, %v1792_v44  ;;  %v14_v44 = vld [vmem:[%s3457_s0 + $0x18] sm:$0x3] }
 0xddd   :  { %2659 = vmatpush3.msra.mxu0 %v1996_v45  ;;  %2666 = vmatprep.mubr.msk.f32.mxu0 %vm3466_vm4, %v2759_v1  ;;  %v1978_v45 = vmul.f32 %v2750_v39, %v14_v44 }
 0xdde   :  { %2660 = vmatprep.subr.mxu0 %v2759_v1 }
 0xddf   :  { %2661 = vmatpush3.msra.mxu0 %v1995_v46 }
 0xde0   :  { %2662 = vmatprep.subr.mxu0 %v2759_v1 }
 0xde1   :  { %2663 = vmatpush3.msra.mxu0 %v1994_v47 }
 0xde2   :  { %2664 = vmatprep.subr.mxu0 %v2759_v1 }
 0xde3   :  { %2665 = vmatpush3.msra.mxu0 %v1993_v48 }
 0xde4   :  { %2667 = vmatmul.mubr.msk.f32.vlgmr.msra.gmra.mxu0 %vm369_vm6, %v3172_v15  ;;  %2669 = vmatprep.subr.mxu0 %v2759_v1  ;;  %v2332_v15 = vld [vmem:[%s3458_s1 + $0x2e8] ss:$0 sm:$0xff]  ;;  %vm3468_vm6 = vmmov %vm3467_vm9 }
 0xde5   :  { %2670 = vmatpush3.msra.mxu0 %v2087_v49  ;;  %2685 = vmatprep.mubr.msk.f32.mxu0 %vm3466_vm4, %v2759_v1  ;;  %vm3469_vm10 = vmmov %vm3468_vm6 }
 0xde6   :  { %2671 = vmatprep.subr.mxu0 %v2759_v1 }
 0xde7   :  { %2672 = vmatpush3.msra.mxu0 %v2086_v50 }
 0xde8   :  { %2673 = vmatprep.subr.mxu0 %v2759_v1 }
 0xde9   :  { %2674 = vmatpush3.msra.mxu0 %v2085_v51 }
 0xdea   :  { %2675 = vmatprep.subr.mxu0 %v2759_v1 }
 0xdeb   :  { %2676 = vmatpush3.msra.mxu0 %v2084_v52 }
 0xdec   :  { %2677 = vmatprep.subr.mxu0 %v2759_v1 }
 0xded   :  { %2678 = vmatpush3.msra.mxu0 %v2083_v53 }
 0xdee   :  { %2679 = vmatprep.subr.mxu0 %v2759_v1 }
 0xdef   :  { %2680 = vmatpush3.msra.mxu0 %v2082_v54 }
 0xdf0   :  { %2681 = vmatprep.subr.mxu0 %v2759_v1 }
 0xdf1   :  { %2682 = vmatpush3.msra.mxu0 %v2081_v55 }
 0xdf2   :  { %2683 = vmatprep.subr.mxu0 %v2759_v1 }
 0xdf3   :  { %2684 = vmatpush3.msra.mxu0 %v2080_v57 }
 0xdf4   :  { %2686 = vmatmul.mubr.msk.f32.vlgmr.msra.gmra.mxu0 %vm3467_vm9, %v2079_v58 }
 0xe9c   :  { %v1871_v62 = vpop.f32.mrf.mxu0 }
 0xe9d   :  { %v1872_v63 = vadd.f32 %v2332_v15, %v1871_v62 }
 0xe9e   :  { %v2638_v0 = vpop.f32.mrf.mxu0 }
 0xe9f   :  { %v1875_v2 = vmax.f32 %v1872_v63, 0.0 }
 0xea1   :  { %2656 = vmatmul.mubr.msk.f32.vlgmr.msra.gmra.mxu1 %vm3468_vm6, %v1875_v2 }
 0xea2   :  { %2689 = vmatpush3.msra.mxu1 %v2187_v3  ;;  %2720 = vmatprep.mubr.msk.f32.mxu1 %vm3466_vm4, %v2759_v1 }
 0xea3   :  { %2690 = vmatprep.subr.mxu1 %v2759_v1 }
 0xea4   :  { %v2071_v8 = vpop.f32.mrf.mxu0  ;;  %2691 = vmatpush3.msra.mxu1 %v2186_v4 }
 0xea5   :  { %2692 = vmatprep.subr.mxu1 %v2759_v1  ;;  %v2072_v7 = vadd.f32 %v2339_v5, %v2071_v8 }
 0xea6   :  { %v2668_v10 = vpop.f32.mrf.mxu0  ;;  %2693 = vmatpush3.msra.mxu1 %v2185_v6 }
 0xea7   :  { %2694 = vmatprep.subr.mxu1 %v2759_v1  ;;  %v2075_v30 = vmax.f32 %v2072_v7, 0.0 }
 0xea8   :  { %2695 = vmatpush3.msra.mxu1 %v2184_v9 }
 0xea9   :  { %2696 = vmatprep.subr.mxu1 %v2759_v1 }
 0xeaa   :  { %2697 = vmatpush3.msra.mxu1 %v2183_v11 }
 0xeab   :  { %2698 = vmatprep.subr.mxu1 %v2759_v1 }
 0xeac   :  { %2699 = vmatpush3.msra.mxu1 %v2182_v12 }
 0xead   :  { %2700 = vmatprep.subr.mxu1 %v2759_v1 }
 0xeae   :  { %2701 = vmatpush3.msra.mxu1 %v2181_v13 }
 0xeaf   :  { %2702 = vmatprep.subr.mxu1 %v2759_v1 }
 0xeb0   :  { %2703 = vmatpush3.msra.mxu1 %v2180_v14 }
 0xeb1   :  { %2704 = vmatprep.subr.mxu1 %v2759_v1 }
 0xeb2   :  { %2705 = vmatpush3.msra.mxu1 %v2179_v16 }
 0xeb3   :  { %2706 = vmatprep.subr.mxu1 %v2759_v1 }
 0xeb4   :  { %v2162_v20 = vpop.f32.mrf.mxu0  ;;  %2707 = vmatpush3.msra.mxu1 %v2178_v17 }
 0xeb5   :  { %v2163_v21 = vadd.f32 %v2341_v18, %v2162_v20  ;;  %2708 = vmatprep.subr.mxu1 %v2759_v1 }
 0xeb6   :  { %v2687_v24 = vpop.f32.mrf.mxu0  ;;  %2709 = vmatpush3.msra.mxu1 %v2177_v19 }
 0xeb7   :  { %v2166_v25 = vmax.f32 %v2163_v21, 0.0  ;;  %2710 = vmatprep.subr.mxu1 %v2759_v1 }
 0xeb8   :  { %2711 = vmatpush3.msra.mxu1 %v2176_v23 }
 0xeb9   :  { %2168 = vrot.lane.b32.xlu0 %v2166_v25, %s2763_s16  ;;  %2712 = vmatprep.subr.mxu1 %v2759_v1 }
 0xeba   :  { %2713 = vmatpush3.msra.mxu1 %v2175_v26 }
 0xebb   :  { %2714 = vmatprep.subr.mxu1 %v2759_v1 }
 0xebc   :  { %2715 = vmatpush3.msra.mxu1 %v2174_v27 }
 0xebd   :  { %2716 = vmatprep.subr.mxu1 %v2759_v1 }
 0xebe   :  { %2717 = vmatpush3.msra.mxu1 %v2173_v28 }
 0xebf   :  { %2718 = vmatprep.subr.mxu1 %v2759_v1 }
 0xec0   :  { %2719 = vmatpush3.msra.mxu1 %v2172_v29 }
 0xf2b   :  { %v2169_v31 = vpop.permute.xlu0 %2168 }
 0xf2c   :  { %v2171_v32 = vsel %vm3469_vm10, %v2075_v30, %v2169_v31 }
 0xf2d   :  { %2721 = vmatmul.mubr.f32.vlgmr.msra.gmra.mxu1 %v2171_v32 }
 0xf61   :  { %v1958_v1 = vpop.f32.mrf.mxu1 }
 0xf62   :  { %v1959_v36 = vadd.f32 %v2334_v34, %v1958_v1 }
 0xf63   :  { %v2657_v37 = vpop.f32.mrf.mxu1 }
 0xf64   :  { %v2336_v38 = vmul.f32 -1.442695, %v1959_v36 }
 0xf66   :  { %2751 = vpow2.f32 %v2336_v38 }
 0xf67   :  { %2753 = vtanh.f32 %v1959_v36 }
 0xf73   :  { %v2752_v40 = vpop.eup %2751 }
 0xf74   :  { %v1966_v41 = vadd.f32 1.0, %v2752_v40  ;;  %v2754_v46 = vpop.eup %2753 }
 0xf76   :  { %2755 = vrcp.f32 %v1966_v41 }
 0xf77   :  { %2757 = vrcp.f32 %v1984_v43 }
 0xf83   :  { %v2756_v47 = vpop.eup %2755 }
 0xf84   :  { %v1970_v48 = vsel %vm1962_vm11, %v2756_v47, %v2754_v46  ;;  %v2758_v52 = vpop.eup %2757 }
 0xf85   :  { %v1979_v49 = vadd.f32 %v1978_v45, %v1970_v48 }
 0xf87   :  { %v1980_v50 = vsub.f32 %v1979_v49, %v1970_v48  ;;  %2264 = vrot.lane.b32.xlu0 %v1979_v49, %s2767_s19 }
 0xf89   :  { %v1981_v51 = vmul.f32 %v1980_v50, %v1980_v50 }
 0xf8b   :  { %2268 = vrot.lane.b32.xlu0 %v1970_v48, %s2768_s20  ;;  %v1982_v53 = vsub.f32 0.0, %v1981_v51 }
 0xf8d   :  { %v1986_v54 = vmul.f32 %v2758_v52, %v1982_v53 }
 0xf8f   :  { %v2338_v55 = vadd.f32 -0.9189385, %v1986_v54 }
 0xf91   :  { %v1988_v56 = vsub.f32 %v2338_v55, %v2337_v33 }
 0xf93   :  { %v1990_v57 = vsel %vm1989_vm12, %v1988_v56, 0.0 }
 0xf94   :  { %1991 = vadd.xlane.f32.xlu1 %v1990_v57 }
 0xfed   :  { %v2259_v22 = vpop.f32.mrf.mxu1 }
 0xfee   :  { %v2260_v61 = vadd.f32 %v2343_v59, %v2259_v22 }
 0xfef   :  { %v2722_v58 = vpop.f32.mrf.mxu1 }
 0xff9   :  { %v2265_v60 = vpop.permute.xlu0 %2264 }
 0xffa   :  { %v2272_v15 = vsel %vm2271_vm13, %v2260_v61, %v2265_v60 }
 0xffd   :  { %v2269_v63 = vpop.permute.xlu0 %2268 }
0x101d   :  { %v1992_v62 = vpop.xlane.xlu1 %1991 }
0x101e   :  { %v2274_v0 = vsel %vm2273_vm14, %v2272_v15, %v1992_v62 }
0x101f   :  { %v2276_v2 = vsel %vm2275_vm15, %v2274_v0, %v2269_v63 }
0x1020   :  { %2278 = vst.msk [vmem:[%s3459_s2] sm:$0x3] %vm2277_vm0, %v2276_v2 }

</bundles_post_ra>
